<compile_context>
chip_gen: v6e
topology: v6e:2x2x1
jax: 0.10.0
libtpu: 0.0.40
codegen_flags: <defaults>
</compile_context>

<pallas_src>
import functools

import jax
import jax.numpy as jnp
from jax.experimental import pallas as pl
from jax.experimental.pallas import tpu as pltpu

_BN_EPS = 1e-5
_LANE = 128          # pad Cout to this: lane-dense stores, MXU-wide N dim
_SUBLANE_BF16 = 16   # bf16 sublane packing: keep the OW window a multiple of this


def _round_up(x, m):
    return (x + m - 1) // m * m


def _pick_tile_oh(oh, ow_c, max_tile_m):
    """Largest divisor of OH such that TILE_M = tile_oh * OW_c <= max_tile_m."""
    for t in range(oh, 0, -1):
        if oh % t == 0 and t * ow_c <= max_tile_m:
            return t
    return 1


def _conv_tile(x_ref, w_ref, *, tile_oh, ow_c, kh_taps, kw_taps, cin, cpad):
    """One conv-output tile [tile_oh*ow_c, cpad] (f32), computed fully in VMEM.

    x_ref: [1, H_pad, W_pad_c, Cin]  bf16  (whole padded image, VMEM resident,
                                            reused across all row-tiles of n)
    w_ref: [KH, KW, Cin, Cpad]       bf16
    im2col never exists in HBM: each (kh, kw) tap is a shifted window load
    followed by a [TILE_M, Cin] @ [Cin, Cpad] bf16 MXU matmul, accumulated f32.
    """
    tile_m = tile_oh * ow_c
    row0 = pl.program_id(1) * tile_oh            # stride == 1
    acc = jnp.zeros((tile_m, cpad), jnp.float32)
    for kh in range(kh_taps):
        for kw in range(kw_taps):
            win = x_ref[0, pl.ds(row0 + kh, tile_oh), kw:kw + ow_c, :]
            # ow_c is a multiple of 16, so collapsing the leading dims is a
            # layout-trivial relabel for bf16 (no data movement).
            lhs = win.reshape(tile_m, cin)
            acc = acc + jnp.dot(lhs, w_ref[kh, kw],
                                preferred_element_type=jnp.float32)
    return acc


def _conv_stats_kernel(x_ref, w_ref, b_ref, stats_ref, *,
                       tile_oh, ow, ow_c, kh_taps, kw_taps, cin, cpad):
    """Pass 1: per-tile per-channel sum and sum-of-squares of (conv + bias)."""
    conv = _conv_tile(x_ref, w_ref, tile_oh=tile_oh, ow_c=ow_c,
                      kh_taps=kh_taps, kw_taps=kw_taps, cin=cin, cpad=cpad)
    conv = conv + b_ref[...]
    if ow_c != ow:
        # Columns ow..ow_c-1 exist only for lane/sublane alignment; keep them
        # out of the batch statistics.  (Not hit in the test config.)
        col = jax.lax.broadcasted_iota(jnp.int32, (tile_oh * ow_c, 1), 0) % ow_c
        conv = jnp.where(col < ow, conv, 0.0)
    stats_ref[0, 0, 0:1, :] = jnp.sum(conv, axis=0, keepdims=True)
    stats_ref[0, 0, 1:2, :] = jnp.sum(conv * conv, axis=0, keepdims=True)


def _conv_bn_relu_kernel(x_ref, w_ref, scale_ref, shift_ref, o_ref, *,
                         tile_oh, ow_c, kh_taps, kw_taps, cin, cpad):
    """Pass 2: conv recompute + fused BN affine (scale/shift) + ReLU, f32 epilogue."""
    conv = _conv_tile(x_ref, w_ref, tile_oh=tile_oh, ow_c=ow_c,
                      kh_taps=kh_taps, kw_taps=kw_taps, cin=cin, cpad=cpad)
    y = conv * scale_ref[...] + shift_ref[...]
    o_ref[0, :, :] = jnp.maximum(y, 0.0).astype(o_ref.dtype)


def conv_bn_relu(x, weight, bias, gamma, beta, *, stride=1, padding=0,
                 max_tile_m=512):
    """Forward of Conv2d -> BatchNorm2d (batch statistics) -> ReLU.

    x: [N, Cin, H, W] (NCHW, PyTorch layout); weight: [Cout, Cin, KH, KW].
    Returns [N, Cout, OH, OW] float32.
    """
    N, Cin, H, W = x.shape
    Cout, Cin_w, KH, KW = weight.shape
    assert Cin == Cin_w
    # TODO(synk): general stride needs strided window loads; module config under test is stride=1.
    assert stride == 1, "Pallas path implements stride=1 only"

    OH = H + 2 * padding - KH + 1
    OW = W + 2 * padding - KW + 1
    H_pad = H + 2 * padding
    ow_c = _round_up(OW, _SUBLANE_BF16)       # alignment-friendly column count
    W_pad_c = ow_c + KW - 1                   # input cols needed for ow_c outputs
    Cpad = _round_up(Cout, _LANE)             # lane-dense output channels

    # ---- layout prep (cheap; x is the small tensor): NCHW -> NHWC,
    #      zero-pad spatially, bf16 for the MXU. ----
    x_nhwc = jnp.transpose(x, (0, 2, 3, 1))
    x_p = jnp.pad(
        x_nhwc,
        ((0, 0), (padding, padding), (padding, W_pad_c - W - padding), (0, 0)),
    ).astype(jnp.bfloat16)
    # [Cout, Cin, KH, KW] -> [KH, KW, Cin, Cpad] (zero-padded channels), bf16.
    w_t = jnp.transpose(weight, (2, 3, 1, 0)).astype(jnp.bfloat16)
    w_t = jnp.pad(w_t, ((0, 0), (0, 0), (0, 0), (0, Cpad - Cout)))

    def _pad_vec(v):
        return jnp.pad(v.astype(jnp.float32), (0, Cpad - Cout)).reshape(1, Cpad)

    b_p, g_p, beta_p = _pad_vec(bias), _pad_vec(gamma), _pad_vec(beta)

    # ---- M tiling: whole output rows per tile so each tile's input window is
    #      a contiguous slab of image rows (no HBM halo duplication). ----
    tile_oh = _pick_tile_oh(OH, ow_c, max_tile_m)
    tile_m = tile_oh * ow_c
    n_ohb = OH // tile_oh
    grid = (N, n_ohb)

    x_spec = pl.BlockSpec((1, H_pad, W_pad_c, Cin), lambda n, t: (n, 0, 0, 0))
    w_spec = pl.BlockSpec((KH, KW, Cin, Cpad), lambda n, t: (0, 0, 0, 0))
    vec_spec = pl.BlockSpec((1, Cpad), lambda n, t: (0, 0))

    cparams = pltpu.CompilerParams(
        # Both grid axes are fully independent -> v7x's 2 TCs can split them.
        dimension_semantics=("parallel", "parallel"),
        # Explicit budget with headroom (v7x: 64 MiB physical / 32 MiB scoped).
        vmem_limit_bytes=32 * 1024 * 1024,
    )

    m_total_c = N * OH * ow_c
    mxu_flops = 2 * m_total_c * KH * KW * Cin * Cpad
    x_bytes = int(x_p.size) * 2
    w_bytes = int(w_t.size) * 2

    conv_kw = dict(tile_oh=tile_oh, ow_c=ow_c, kh_taps=KH, kw_taps=KW,
                   cin=Cin, cpad=Cpad)

    # ---- pass 1: conv + bias -> per-tile per-channel sum / sum(x^2) ----
    stats = pl.pallas_call(
        functools.partial(_conv_stats_kernel, ow=OW, **conv_kw),
        out_shape=jax.ShapeDtypeStruct((N, n_ohb, 2, Cpad), jnp.float32),
        grid=grid,
        in_specs=[x_spec, w_spec, vec_spec],
        out_specs=pl.BlockSpec((1, 1, 2, Cpad), lambda n, t: (n, t, 0, 0)),
        compiler_params=cparams,
        cost_estimate=pl.CostEstimate(
            flops=mxu_flops + 3 * m_total_c * Cpad,
            transcendentals=0,
            bytes_accessed=x_bytes + w_bytes + N * n_ohb * 2 * Cpad * 4,
        ),
    )(x_p, w_t, b_p)

    # ---- tiny cross-tile combine: global training-mode BN statistics ----
    m_total = N * OH * OW                               # real elements per channel
    sums = jnp.sum(stats, axis=(0, 1))                  # [2, Cpad]
    mean = sums[0] / m_total
    var = jnp.maximum(sums[1] / m_total - mean * mean, 0.0)   # biased batch var
    rstd = jax.lax.rsqrt(var + _BN_EPS)
    scale_v = g_p[0] * rstd                             # gamma / sqrt(var + eps)
    shift_v = (b_p[0] - mean) * scale_v + beta_p[0]     # folds the conv bias in
    scale2d = scale_v.reshape(1, Cpad)
    shift2d = shift_v.reshape(1, Cpad)

    # ---- pass 2: conv recompute + fused normalize + ReLU (NHWC, lane-dense) ----
    out_flat = pl.pallas_call(
        functools.partial(_conv_bn_relu_kernel, **conv_kw),
        out_shape=jax.ShapeDtypeStruct((N, OH * ow_c, Cpad), jnp.float32),
        grid=grid,
        in_specs=[x_spec, w_spec, vec_spec, vec_spec],
        out_specs=pl.BlockSpec((1, tile_m, Cpad), lambda n, t: (n, t, 0)),
        compiler_params=cparams,
        cost_estimate=pl.CostEstimate(
            flops=mxu_flops + 3 * m_total_c * Cpad,
            transcendentals=0,
            bytes_accessed=x_bytes + w_bytes + N * OH * ow_c * Cpad * 4,
        ),
    )(x_p, w_t, scale2d, shift2d)

    # Slice away channel/column padding; NCHW only at the PyTorch API boundary.
    out = out_flat.reshape(N, OH, ow_c, Cpad)[:, :, :OW, :Cout]
    return jnp.transpose(out, (0, 3, 1, 2))


def _reference(x, weight, bias, gamma, beta, *, stride, padding):
    """Pure-JAX reference: conv (bf16 inputs, f32 accum, matching the kernel's
    deliberate bf16 MXU feed) + training-mode BN + ReLU."""
    conv = jax.lax.conv_general_dilated(
        x.astype(jnp.bfloat16),
        weight.astype(jnp.bfloat16),
        window_strides=(stride, stride),
        padding=[(padding, padding), (padding, padding)],
        dimension_numbers=("NCHW", "OIHW", "NCHW"),
        preferred_element_type=jnp.float32,
    ) + bias.reshape(1, -1, 1, 1).astype(jnp.float32)
    mean = jnp.mean(conv, axis=(0, 2, 3), keepdims=True)
    var = jnp.mean((conv - mean) ** 2, axis=(0, 2, 3), keepdims=True)
    y = (conv - mean) * jax.lax.rsqrt(var + _BN_EPS)
    y = y * gamma.reshape(1, -1, 1, 1) + beta.reshape(1, -1, 1, 1)
    return jnp.maximum(y, 0.0)


if __name__ == "__main__":
    # Module config: Conv2d(in_channels=4, out_channels=8, kernel_size=3,
    #                       stride=1, padding=1, bias=True) -> BatchNorm2d(8) -> ReLU
    N, Cin, H, W = 2, 4, 16, 16
    Cout, KH, KW = 8, 3, 3
    stride, padding = 1, 1

    key = jax.random.PRNGKey(0)
    kx, kw_key, kb = jax.random.split(key, 3)

    x = jax.random.normal(kx, (N, Cin, H, W), dtype=jnp.float32)
    # Deterministic parameter init mimicking the scale of PyTorch's defaults.
    fan_in = Cin * KH * KW
    bound = 1.0 / (fan_in ** 0.5)
    weight = jax.random.uniform(kw_key, (Cout, Cin, KH, KW), jnp.float32, -bound, bound)
    bias = jax.random.uniform(kb, (Cout,), jnp.float32, -bound, bound)
    gamma = jnp.ones((Cout,), jnp.float32)   # BatchNorm2d default init
    beta = jnp.zeros((Cout,), jnp.float32)

    # max_tile_m=128 so even this toy 16x16 image exercises the multi-tile
    # cross-tile-BN-stats path (grid = (N, 2)); the default (512) targets
    # realistic activation sizes.
    out = conv_bn_relu(x, weight, bias, gamma, beta,
                       stride=stride, padding=padding, max_tile_m=128)
    out = jax.block_until_ready(out)

    ref = _reference(x, weight, bias, gamma, beta, stride=stride, padding=padding)
    assert out.shape == (N, Cout, H, W), out.shape
    max_err = float(jnp.max(jnp.abs(out - ref)))
    assert jnp.allclose(out, ref, rtol=2e-3, atol=2e-3), (
        f"mismatch vs reference (max|err|={max_err})")

    print("KERNEL_OK")
</pallas_src>

<mosaic_0001>
module attributes {stable_mosaic.version = 11 : i64} {
  func.func @_conv_stats_kernel(%arg0: i32, %arg1: i32, %arg2: memref<1x18x18x4xbf16, #tpu.memory_space<vmem>>, %arg3: memref<3x3x4x128xbf16, #tpu.memory_space<vmem>>, %arg4: memref<1x128xf32, #tpu.memory_space<vmem>>, %arg5: memref<1x1x2x128xf32, #tpu.memory_space<vmem>>) attributes {dimension_semantics = [#tpu.dimension_semantics<parallel>, #tpu.dimension_semantics<parallel>], iteration_bounds = array<i64: 2, 2>, scalar_prefetch = 0 : i64, scratch_operands = 0 : i64, tpu.core_type = #tpu.core_type<tc>, window_params = [{transform_indices = @transform_0, window_bounds = array<i64: 1, 18, 18, 4>}, {pipeline_mode = #tpu.pipeline_mode<synchronous>, transform_indices = @transform_1, window_bounds = array<i64: 3, 3, 4, 128>}, {pipeline_mode = #tpu.pipeline_mode<synchronous>, transform_indices = @transform_2, window_bounds = array<i64: 1, 128>}, {transform_indices = @transform_3, window_bounds = array<i64: 1, 1, 2, 128>}]} {
    %c8_i32 = arith.constant 8 : i32
    %0 = arith.muli %arg1, %c8_i32 : i32
    %cst = arith.constant 0.000000e+00 : f32
    %1 = vector.broadcast %cst : f32 to vector<128x128xf32>
    %c0_i32 = arith.constant 0 : i32
    %2 = arith.addi %0, %c0_i32 : i32
    %c0 = arith.constant 0 : index
    %3 = arith.index_cast %2 : i32 to index
    %c0_0 = arith.constant 0 : index
    %c0_1 = arith.constant 0 : index
    %4 = vector.load %arg2[%c0, %3, %c0_0, %c0_1] : memref<1x18x18x4xbf16, #tpu.memory_space<vmem>>, vector<1x8x16x4xbf16>
    %5 = vector.shape_cast %4 : vector<1x8x16x4xbf16> to vector<8x16x4xbf16>
    %6 = vector.shape_cast %5 : vector<8x16x4xbf16> to vector<128x4xbf16>
    %c0_2 = arith.constant 0 : index
    %c0_3 = arith.constant 0 : index
    %c0_4 = arith.constant 0 : index
    %c0_5 = arith.constant 0 : index
    %7 = vector.load %arg3[%c0_2, %c0_3, %c0_4, %c0_5] : memref<3x3x4x128xbf16, #tpu.memory_space<vmem>>, vector<1x1x4x128xbf16>
    %8 = vector.shape_cast %7 : vector<1x1x4x128xbf16> to vector<4x128xbf16>
    %cst_6 = arith.constant dense<0.000000e+00> : vector<128x128xf32>
    %9 = tpu.matmul %6, %8, %cst_6 {dimension_numbers = #tpu.dot_dimension_numbers<[1], [0], [0], [1], [0, 0, 1, 1], [], []>} : vector<128x4xbf16>, vector<4x128xbf16>, vector<128x128xf32> -> vector<128x128xf32>
    %10 = arith.addf %1, %9 : vector<128x128xf32>
    %c0_i32_7 = arith.constant 0 : i32
    %11 = arith.addi %0, %c0_i32_7 : i32
    %c0_8 = arith.constant 0 : index
    %12 = arith.index_cast %11 : i32 to index
    %c1 = arith.constant 1 : index
    %c0_9 = arith.constant 0 : index
    %13 = vector.load %arg2[%c0_8, %12, %c1, %c0_9] : memref<1x18x18x4xbf16, #tpu.memory_space<vmem>>, vector<1x8x16x4xbf16>
    %14 = vector.shape_cast %13 : vector<1x8x16x4xbf16> to vector<8x16x4xbf16>
    %15 = vector.shape_cast %14 : vector<8x16x4xbf16> to vector<128x4xbf16>
    %c0_10 = arith.constant 0 : index
    %c1_11 = arith.constant 1 : index
    %c0_12 = arith.constant 0 : index
    %c0_13 = arith.constant 0 : index
    %16 = vector.load %arg3[%c0_10, %c1_11, %c0_12, %c0_13] : memref<3x3x4x128xbf16, #tpu.memory_space<vmem>>, vector<1x1x4x128xbf16>
    %17 = vector.shape_cast %16 : vector<1x1x4x128xbf16> to vector<4x128xbf16>
    %cst_14 = arith.constant dense<0.000000e+00> : vector<128x128xf32>
    %18 = tpu.matmul %15, %17, %cst_14 {dimension_numbers = #tpu.dot_dimension_numbers<[1], [0], [0], [1], [0, 0, 1, 1], [], []>} : vector<128x4xbf16>, vector<4x128xbf16>, vector<128x128xf32> -> vector<128x128xf32>
    %19 = arith.addf %10, %18 : vector<128x128xf32>
    %c0_i32_15 = arith.constant 0 : i32
    %20 = arith.addi %0, %c0_i32_15 : i32
    %c0_16 = arith.constant 0 : index
    %21 = arith.index_cast %20 : i32 to index
    %c2 = arith.constant 2 : index
    %c0_17 = arith.constant 0 : index
    %22 = vector.load %arg2[%c0_16, %21, %c2, %c0_17] : memref<1x18x18x4xbf16, #tpu.memory_space<vmem>>, vector<1x8x16x4xbf16>
    %23 = vector.shape_cast %22 : vector<1x8x16x4xbf16> to vector<8x16x4xbf16>
    %24 = vector.shape_cast %23 : vector<8x16x4xbf16> to vector<128x4xbf16>
    %c0_18 = arith.constant 0 : index
    %c2_19 = arith.constant 2 : index
    %c0_20 = arith.constant 0 : index
    %c0_21 = arith.constant 0 : index
    %25 = vector.load %arg3[%c0_18, %c2_19, %c0_20, %c0_21] : memref<3x3x4x128xbf16, #tpu.memory_space<vmem>>, vector<1x1x4x128xbf16>
    %26 = vector.shape_cast %25 : vector<1x1x4x128xbf16> to vector<4x128xbf16>
    %cst_22 = arith.constant dense<0.000000e+00> : vector<128x128xf32>
    %27 = tpu.matmul %24, %26, %cst_22 {dimension_numbers = #tpu.dot_dimension_numbers<[1], [0], [0], [1], [0, 0, 1, 1], [], []>} : vector<128x4xbf16>, vector<4x128xbf16>, vector<128x128xf32> -> vector<128x128xf32>
    %28 = arith.addf %19, %27 : vector<128x128xf32>
    %c1_i32 = arith.constant 1 : i32
    %29 = arith.addi %0, %c1_i32 : i32
    %c0_23 = arith.constant 0 : index
    %30 = arith.index_cast %29 : i32 to index
    %c0_24 = arith.constant 0 : index
    %c0_25 = arith.constant 0 : index
    %31 = vector.load %arg2[%c0_23, %30, %c0_24, %c0_25] : memref<1x18x18x4xbf16, #tpu.memory_space<vmem>>, vector<1x8x16x4xbf16>
    %32 = vector.shape_cast %31 : vector<1x8x16x4xbf16> to vector<8x16x4xbf16>
    %33 = vector.shape_cast %32 : vector<8x16x4xbf16> to vector<128x4xbf16>
    %c1_26 = arith.constant 1 : index
    %c0_27 = arith.constant 0 : index
    %c0_28 = arith.constant 0 : index
    %c0_29 = arith.constant 0 : index
    %34 = vector.load %arg3[%c1_26, %c0_27, %c0_28, %c0_29] : memref<3x3x4x128xbf16, #tpu.memory_space<vmem>>, vector<1x1x4x128xbf16>
    %35 = vector.shape_cast %34 : vector<1x1x4x128xbf16> to vector<4x128xbf16>
    %cst_30 = arith.constant dense<0.000000e+00> : vector<128x128xf32>
    %36 = tpu.matmul %33, %35, %cst_30 {dimension_numbers = #tpu.dot_dimension_numbers<[1], [0], [0], [1], [0, 0, 1, 1], [], []>} : vector<128x4xbf16>, vector<4x128xbf16>, vector<128x128xf32> -> vector<128x128xf32>
    %37 = arith.addf %28, %36 : vector<128x128xf32>
    %c1_i32_31 = arith.constant 1 : i32
    %38 = arith.addi %0, %c1_i32_31 : i32
    %c0_32 = arith.constant 0 : index
    %39 = arith.index_cast %38 : i32 to index
    %c1_33 = arith.constant 1 : index
    %c0_34 = arith.constant 0 : index
    %40 = vector.load %arg2[%c0_32, %39, %c1_33, %c0_34] : memref<1x18x18x4xbf16, #tpu.memory_space<vmem>>, vector<1x8x16x4xbf16>
    %41 = vector.shape_cast %40 : vector<1x8x16x4xbf16> to vector<8x16x4xbf16>
    %42 = vector.shape_cast %41 : vector<8x16x4xbf16> to vector<128x4xbf16>
    %c1_35 = arith.constant 1 : index
    %c1_36 = arith.constant 1 : index
    %c0_37 = arith.constant 0 : index
    %c0_38 = arith.constant 0 : index
    %43 = vector.load %arg3[%c1_35, %c1_36, %c0_37, %c0_38] : memref<3x3x4x128xbf16, #tpu.memory_space<vmem>>, vector<1x1x4x128xbf16>
    %44 = vector.shape_cast %43 : vector<1x1x4x128xbf16> to vector<4x128xbf16>
    %cst_39 = arith.constant dense<0.000000e+00> : vector<128x128xf32>
    %45 = tpu.matmul %42, %44, %cst_39 {dimension_numbers = #tpu.dot_dimension_numbers<[1], [0], [0], [1], [0, 0, 1, 1], [], []>} : vector<128x4xbf16>, vector<4x128xbf16>, vector<128x128xf32> -> vector<128x128xf32>
    %46 = arith.addf %37, %45 : vector<128x128xf32>
    %c1_i32_40 = arith.constant 1 : i32
    %47 = arith.addi %0, %c1_i32_40 : i32
    %c0_41 = arith.constant 0 : index
    %48 = arith.index_cast %47 : i32 to index
    %c2_42 = arith.constant 2 : index
    %c0_43 = arith.constant 0 : index
    %49 = vector.load %arg2[%c0_41, %48, %c2_42, %c0_43] : memref<1x18x18x4xbf16, #tpu.memory_space<vmem>>, vector<1x8x16x4xbf16>
    %50 = vector.shape_cast %49 : vector<1x8x16x4xbf16> to vector<8x16x4xbf16>
    %51 = vector.shape_cast %50 : vector<8x16x4xbf16> to vector<128x4xbf16>
    %c1_44 = arith.constant 1 : index
    %c2_45 = arith.constant 2 : index
    %c0_46 = arith.constant 0 : index
    %c0_47 = arith.constant 0 : index
    %52 = vector.load %arg3[%c1_44, %c2_45, %c0_46, %c0_47] : memref<3x3x4x128xbf16, #tpu.memory_space<vmem>>, vector<1x1x4x128xbf16>
    %53 = vector.shape_cast %52 : vector<1x1x4x128xbf16> to vector<4x128xbf16>
    %cst_48 = arith.constant dense<0.000000e+00> : vector<128x128xf32>
    %54 = tpu.matmul %51, %53, %cst_48 {dimension_numbers = #tpu.dot_dimension_numbers<[1], [0], [0], [1], [0, 0, 1, 1], [], []>} : vector<128x4xbf16>, vector<4x128xbf16>, vector<128x128xf32> -> vector<128x128xf32>
    %55 = arith.addf %46, %54 : vector<128x128xf32>
    %c2_i32 = arith.constant 2 : i32
    %56 = arith.addi %0, %c2_i32 : i32
    %c0_49 = arith.constant 0 : index
    %57 = arith.index_cast %56 : i32 to index
    %c0_50 = arith.constant 0 : index
    %c0_51 = arith.constant 0 : index
    %58 = vector.load %arg2[%c0_49, %57, %c0_50, %c0_51] : memref<1x18x18x4xbf16, #tpu.memory_space<vmem>>, vector<1x8x16x4xbf16>
    %59 = vector.shape_cast %58 : vector<1x8x16x4xbf16> to vector<8x16x4xbf16>
    %60 = vector.shape_cast %59 : vector<8x16x4xbf16> to vector<128x4xbf16>
    %c2_52 = arith.constant 2 : index
    %c0_53 = arith.constant 0 : index
    %c0_54 = arith.constant 0 : index
    %c0_55 = arith.constant 0 : index
    %61 = vector.load %arg3[%c2_52, %c0_53, %c0_54, %c0_55] : memref<3x3x4x128xbf16, #tpu.memory_space<vmem>>, vector<1x1x4x128xbf16>
    %62 = vector.shape_cast %61 : vector<1x1x4x128xbf16> to vector<4x128xbf16>
    %cst_56 = arith.constant dense<0.000000e+00> : vector<128x128xf32>
    %63 = tpu.matmul %60, %62, %cst_56 {dimension_numbers = #tpu.dot_dimension_numbers<[1], [0], [0], [1], [0, 0, 1, 1], [], []>} : vector<128x4xbf16>, vector<4x128xbf16>, vector<128x128xf32> -> vector<128x128xf32>
    %64 = arith.addf %55, %63 : vector<128x128xf32>
    %c2_i32_57 = arith.constant 2 : i32
    %65 = arith.addi %0, %c2_i32_57 : i32
    %c0_58 = arith.constant 0 : index
    %66 = arith.index_cast %65 : i32 to index
    %c1_59 = arith.constant 1 : index
    %c0_60 = arith.constant 0 : index
    %67 = vector.load %arg2[%c0_58, %66, %c1_59, %c0_60] : memref<1x18x18x4xbf16, #tpu.memory_space<vmem>>, vector<1x8x16x4xbf16>
    %68 = vector.shape_cast %67 : vector<1x8x16x4xbf16> to vector<8x16x4xbf16>
    %69 = vector.shape_cast %68 : vector<8x16x4xbf16> to vector<128x4xbf16>
    %c2_61 = arith.constant 2 : index
    %c1_62 = arith.constant 1 : index
    %c0_63 = arith.constant 0 : index
    %c0_64 = arith.constant 0 : index
    %70 = vector.load %arg3[%c2_61, %c1_62, %c0_63, %c0_64] : memref<3x3x4x128xbf16, #tpu.memory_space<vmem>>, vector<1x1x4x128xbf16>
    %71 = vector.shape_cast %70 : vector<1x1x4x128xbf16> to vector<4x128xbf16>
    %cst_65 = arith.constant dense<0.000000e+00> : vector<128x128xf32>
    %72 = tpu.matmul %69, %71, %cst_65 {dimension_numbers = #tpu.dot_dimension_numbers<[1], [0], [0], [1], [0, 0, 1, 1], [], []>} : vector<128x4xbf16>, vector<4x128xbf16>, vector<128x128xf32> -> vector<128x128xf32>
    %73 = arith.addf %64, %72 : vector<128x128xf32>
    %c2_i32_66 = arith.constant 2 : i32
    %74 = arith.addi %0, %c2_i32_66 : i32
    %c0_67 = arith.constant 0 : index
    %75 = arith.index_cast %74 : i32 to index
    %c2_68 = arith.constant 2 : index
    %c0_69 = arith.constant 0 : index
    %76 = vector.load %arg2[%c0_67, %75, %c2_68, %c0_69] : memref<1x18x18x4xbf16, #tpu.memory_space<vmem>>, vector<1x8x16x4xbf16>
    %77 = vector.shape_cast %76 : vector<1x8x16x4xbf16> to vector<8x16x4xbf16>
    %78 = vector.shape_cast %77 : vector<8x16x4xbf16> to vector<128x4xbf16>
    %c2_70 = arith.constant 2 : index
    %c2_71 = arith.constant 2 : index
    %c0_72 = arith.constant 0 : index
    %c0_73 = arith.constant 0 : index
    %79 = vector.load %arg3[%c2_70, %c2_71, %c0_72, %c0_73] : memref<3x3x4x128xbf16, #tpu.memory_space<vmem>>, vector<1x1x4x128xbf16>
    %80 = vector.shape_cast %79 : vector<1x1x4x128xbf16> to vector<4x128xbf16>
    %cst_74 = arith.constant dense<0.000000e+00> : vector<128x128xf32>
    %81 = tpu.matmul %78, %80, %cst_74 {dimension_numbers = #tpu.dot_dimension_numbers<[1], [0], [0], [1], [0, 0, 1, 1], [], []>} : vector<128x4xbf16>, vector<4x128xbf16>, vector<128x128xf32> -> vector<128x128xf32>
    %82 = arith.addf %73, %81 : vector<128x128xf32>
    %c0_75 = arith.constant 0 : index
    %c0_76 = arith.constant 0 : index
    %83 = vector.load %arg4[%c0_75, %c0_76] : memref<1x128xf32, #tpu.memory_space<vmem>>, vector<1x128xf32>
    %84 = vector.broadcast %83 : vector<1x128xf32> to vector<128x128xf32>
    %85 = arith.addf %82, %84 : vector<128x128xf32>
    %cst_77 = arith.constant dense<0.000000e+00> : vector<128xf32>
    %86 = vector.multi_reduction <add>, %85, %cst_77 [0] : vector<128x128xf32> to vector<128xf32>
    %87 = vector.shape_cast %86 : vector<128xf32> to vector<1x128xf32>
    %c0_78 = arith.constant 0 : index
    %c0_79 = arith.constant 0 : index
    %c0_80 = arith.constant 0 : index
    %c0_81 = arith.constant 0 : index
    %88 = vector.load %arg5[%c0_78, %c0_79, %c0_80, %c0_81] : memref<1x1x2x128xf32, #tpu.memory_space<vmem>>, vector<1x1x1x128xf32>
    %89 = vector.shape_cast %88 : vector<1x1x1x128xf32> to vector<1x128xf32>
    %90 = vector.shape_cast %87 : vector<1x128xf32> to vector<1x1x1x128xf32>
    tpu.vector_store %arg5[%c0_78, %c0_79, %c0_80, %c0_81], %90 {strides = array<i32>} : memref<1x1x2x128xf32, #tpu.memory_space<vmem>>, vector<1x1x1x128xf32>,
    %91 = arith.mulf %85, %85 : vector<128x128xf32>
    %cst_82 = arith.constant dense<0.000000e+00> : vector<128xf32>
    %92 = vector.multi_reduction <add>, %91, %cst_82 [0] : vector<128x128xf32> to vector<128xf32>
    %93 = vector.shape_cast %92 : vector<128xf32> to vector<1x128xf32>
    %c0_83 = arith.constant 0 : index
    %c0_84 = arith.constant 0 : index
    %c1_85 = arith.constant 1 : index
    %c0_86 = arith.constant 0 : index
    %94 = vector.load %arg5[%c0_83, %c0_84, %c1_85, %c0_86] : memref<1x1x2x128xf32, #tpu.memory_space<vmem>>, vector<1x1x1x128xf32>
    %95 = vector.shape_cast %94 : vector<1x1x1x128xf32> to vector<1x128xf32>
    %96 = vector.shape_cast %93 : vector<1x128xf32> to vector<1x1x1x128xf32>
    tpu.vector_store %arg5[%c0_83, %c0_84, %c1_85, %c0_86], %96 {strides = array<i32>} : memref<1x1x2x128xf32, #tpu.memory_space<vmem>>, vector<1x1x1x128xf32>,
    return
  }
  func.func @transform_0(%arg0: i32, %arg1: i32) -> (i32, i32, i32, i32) {
    %c0_i32 = arith.constant 0 : i32
    %c0_i32_0 = arith.constant 0 : i32
    %c0_i32_1 = arith.constant 0 : i32
    %c0_i32_2 = arith.constant 0 : i32
    return %arg0, %c0_i32, %c0_i32_0, %c0_i32_1 : i32, i32, i32, i32
  }
  func.func @transform_1(%arg0: i32, %arg1: i32) -> (i32, i32, i32, i32) {
    %c0_i32 = arith.constant 0 : i32
    %c0_i32_0 = arith.constant 0 : i32
    %c0_i32_1 = arith.constant 0 : i32
    %c0_i32_2 = arith.constant 0 : i32
    %c0_i32_3 = arith.constant 0 : i32
    return %c0_i32, %c0_i32_0, %c0_i32_1, %c0_i32_2 : i32, i32, i32, i32
  }
  func.func @transform_2(%arg0: i32, %arg1: i32) -> (i32, i32) {
    %c0_i32 = arith.constant 0 : i32
    %c0_i32_0 = arith.constant 0 : i32
    %c0_i32_1 = arith.constant 0 : i32
    return %c0_i32, %c0_i32_0 : i32, i32
  }
  func.func @transform_3(%arg0: i32, %arg1: i32) -> (i32, i32, i32, i32) {
    %c0_i32 = arith.constant 0 : i32
    %c0_i32_0 = arith.constant 0 : i32
    %c0_i32_1 = arith.constant 0 : i32
    return %arg0, %arg1, %c0_i32, %c0_i32_0 : i32, i32, i32, i32
  }
}

</mosaic_0001>

<bundles_post_ra>
// kernel: tpu_custom_call.1
= control target key start
LH: loop header
LB: loop body
LE: loop exit
PB: predicated region body
PF: predicated region fallthrough
CT: control target
= control target key end

     0   :  { %8 = vsyncpa [#allocation3], 0  ;;  %s4788_s0 = inlined_call_operand.vmem [shape: bf16[2,18,18,4], index: 0, kind: input, shape index: {}]   ;;  %s4789_s1 = inlined_call_operand.vmem [shape: bf16[3,3,4,128], index: 1, kind: input, shape index: {}]   ;;  %s4790_s2 = inlined_call_operand.vmem [shape: f32[1,128], index: 2, kind: input, shape index: {}]   ;;  %s4791_s3 = inlined_call_operand.hbm [shape: f32[2,2,2,128], index: 3, kind: output, shape index: {}]  }
   0x1   :  { %10 = vsyncpa [#allocation3 + $0x1], 0  ;;  %s3589_s12 = smov 0   ;;  %s3591_s13 = smov 0  }
   0x2   :  { %s3593_s14 = smov 0   ;;  %s3595_s15 = smov 0  }
   0x3   :  { %s3597_s16 = smov 0   ;;  %s3599_s17 = smov 0  }
   0x4   :  { %s3601_s18 = smov 0   ;;  %s3603_s19 = smov 0  }
   0x5 LB: > { %s2830_s20 = sadd.s32 4294967295, %s3566_s19   ;;  %s2831_s21 = sadd.s32 4294967294, %s3566_s19   ;;  %s3566_s19 = sphi %s3603_s19, %s16_s19   ;;  %s3562_s18 = sphi %s3601_s18, %s4840_s18   ;;  %s3558_s17 = sphi %s3599_s17, %s4839_s17   ;;  %s3554_s16 = sphi %s3597_s16, %s4838_s16   ;;  %s3550_s15 = sphi %s3595_s15, %s4837_s15   ;;  %s3546_s14 = sphi %s3593_s14, %s4836_s14   ;;  %s3542_s13 = sphi %s3591_s13, %s4835_s13   ;;  %s3538_s12 = sphi %s3589_s12, %s4834_s12  }
   0x6   : > { %s25_s22 = sadd.s32 1, %s3558_s17  ;;  %s28_s23 = sadd.s32 1, %s3562_s18 }
   0x7   : > { %p26_p0 = scmp.ge.s32.totalorder %s25_s22, 2  ;;  %p115_p1 = scmp.ne.s32.totalorder %s3546_s14, %s3542_s13 }
   0x8   : > { %p116_p2 = scmp.eq.s32.totalorder %s2830_s20, 3  ;;  %p121_p5 = scmp.ne.s32.totalorder %s3542_s13, %s3538_s12 }
   0x9   : > { %s4842_s22 = smov (%p26_p0, %s25_s22), 0  ;;  %s4844_s23 = smov (!%p26_p0, %s28_s23), %s3562_s18 }
   0xa   : > { %s101_s24 = ssub.s32 %s3558_s17, %s4842_s22  ;;  %p3640_p3 = por %p116_p2, %p115_p1 }
   0xb   : > { %p30_p4 = scmp.ge.s32.totalorder %s4844_s23, 2  ;;  %p122_p6 = scmp.eq.s32.totalorder %s2831_s21, 3 }
   0xc   : > { %p2834_p7 = scmp.ge.s32.totalorder %s3566_s19, 1  ;;  %p154_p9 = scmp.lt.s32.totalorder %s3566_s19, 5 }
   0xd   : > { %s4846_s23 = smov (%p30_p4, %s4844_s23), 0  ;;  %p3649_p8 = por %p122_p6, %p121_p5 }
   0xe   : > { %s100_s27 = ssub.s32 %s3562_s18, %s4846_s23  ;;  %s105_s28 = sadd.s32 1, %s3546_s14 }
   0xf   : > { %s102_s29 = sor.u32 %s101_s24, %s100_s27  ;;  %p155_p10 = pnand %p2834_p7, %p154_p9 }
  0x10   : > { %p103_p11 = scmp.eq.s32.totalorder %s102_s29, 0 }
  0x11   : > { %158 = sbr.rel (%p155_p10) target bundleno = 437 (0x1b5), region = 32 }
  0x12   : > { %s3658_s30 = scalar_select %p103_p11, %s3546_s14, %s105_s28  }
  0x16   : > { %v2840_v0 = vld [vmem:[%s4789_s1 + $0x2] sm:$0x3]  ;;  %vm459_vm0 = vcmask 1041408   ;;  %p178_p12 = scmp.lt.s32.totalorder %s3554_s16, 1  ;;  %v204_v2 = vld [vmem:[%s4789_s1] sm:$0x3] }
  0x17   : > { %3369 = vmatprep.subr.msk.bf16.mxu1 %vm459_vm0, %v2840_v0  ;;  %3368 = vmatprep.subr.msk.bf16.mxu0 %vm459_vm0, %v2840_v0  ;;  %v461_v1 = vsel %vm459_vm0, %v2840_v0, 0  ;;  %v2881_v3 = vld [vmem:[%s4789_s1 + $0x4] sm:$0x3]  ;;  %s3122_s11 = smul.u32 96, %s3550_s15  ;;  %vm213_vm1 = vsmask.f32 3328 }
  0x18   : > { %3367 = vmatpush3.bf16.msra.mxu1 %v461_v1  ;;  %3205 = vmatpush3.bf16.msra.mxu0 %v461_v1  ;;  %s179_s6 = scalar_select %p178_p12, %s3554_s16, 1  ;;  %vm214_vm2 = vsmask.f32 7440  ;;  %vm434_vm3 = vcmask 31744   ;;  %v3706_v15 = vsel %vm459_vm0, %v204_v2, 0  ;;  %v3726_v34 = vsel %vm459_vm0, %v2881_v3, 0 }
  0x19   : > { %3370 = vmatprep.subr.msk.bf16.mxu1 %vm459_vm0, %v204_v2  ;;  %3371 = vmatprep.subr.msk.bf16.mxu0 %vm459_vm0, %v2881_v3  ;;  %vm3721_vm4 = vmor %vm213_vm1, %vm214_vm2  ;;  %vm748_vm5 = vcmask 1042432   ;;  %vm749_vm6 = vcmask 1046532   ;;  %s175_s29 = sand.u32 1, %s3542_s13   ;;  %s3118_s5 = sshll.u32 %s3554_s16, 1 }
  0x1a   : > { %s3378_s20 = smul.u32 216, %s179_s6  ;;  %vm3857_vm7 = vmor %vm748_vm5, %vm749_vm6  ;;  %s2835_s4 = sshll.u32 %s175_s29, 1 }
  0x1b   : > { %s2744_s6 = sadd.s32 %s3550_s15, %s3118_s5  ;;  %s177_s8 = scalar_lea.vmem [#allocation2], %s2835_s4 }
  0x1c   : > { %s182_s27 = scalar_lea.vmem %s4788_s0, %s3378_s20  ;;  %s3119_s7 = sshll.u32 %s2744_s6, 5 }
  0x1d   : > { %s3680_s28 = scalar_lea.vmem %s182_s27, %s3122_s11  ;;  %s2748_s9 = sshll.u32 %s177_s8, 4  ;;  %s2749_s9 = int_to_ptr.vmem [resolvable:$true] %s2748_s9 }
  0x1e   : > { %v3683_v4 = vld [vmem:[%s3680_s28] sm:$0xf]  ;;  %v3686_v5 = vld [vmem:[%s3680_s28 + $0x4] sm:$0xf]  ;;  %v3689_v6 = vld [vmem:[%s3680_s28 + $0x8] sm:$0x1]  ;;  %s2746_s20 = scalar_lea.hbm %s4791_s3, %s3119_s7 }
  0x1f   : > { %v217_v7 = vshrl.u32 %v3683_v4, 16  ;;  %v220_v8 = vshll.u32 %v3683_v4, 16  ;;  %v226_v9 = vshll.u32 %v3686_v5, 16  ;;  %v230_v10 = vshrl.u32 %v3686_v5, 16  ;;  %v3696_v11 = vld [vmem:[%s3680_s28 + $0x30] sm:$0xf] }
  0x20   : > { %v236_v12 = vshll.u32 %v3689_v6, 16  ;;  %v3700_v13 = vld [vmem:[%s3680_s28 + $0x34] sm:$0xf]  ;;  %v3703_v14 = vld [vmem:[%s3680_s28 + $0x38] sm:$0x1]  ;;  %v313_v21 = vshrl.u32 %v3696_v11, 16 }
  0x21   : > { %v219_v16 = vrot.slane %v217_v7, 4  ;;  %v222_v17 = vrot.slane %v220_v8, 5  ;;  %v228_v18 = vrot.slane %v226_v9, 5  ;;  %v232_v19 = vrot.slane %v230_v10, 4  ;;  %v3714_v28 = vld [vmem:[%s3680_s28 + $0xc] sm:$0xf] }
  0x22   : > { %v238_v20 = vrot.slane %v236_v12, 5  ;;  %v316_v22 = vshll.u32 %v3696_v11, 16  ;;  %v322_v23 = vshll.u32 %v3700_v13, 16  ;;  %v326_v26 = vshrl.u32 %v3700_v13, 16  ;;  %v3717_v29 = vld [vmem:[%s3680_s28 + $0x10] sm:$0xf] }
  0x23   : > { %v223_v24 = vor.u32 %v222_v17, %v219_v16  ;;  %v233_v25 = vor.u32 %v232_v19, %v228_v18  ;;  %v332_v27 = vshll.u32 %v3703_v14, 16  ;;  %v315_v31 = vrot.slane %v313_v21, 4  ;;  %v3729_v40 = vld [vmem:[%s3680_s28 + $0x14] sm:$0x1]  ;;  %v3740_v52 = vld [vmem:[%s3680_s28 + $0x3c] sm:$0xf] }
  0x24   : > { %v318_v32 = vrot.slane %v316_v22, 5  ;;  %v324_v33 = vrot.slane %v322_v23, 5  ;;  %v328_v37 = vrot.slane %v326_v26, 4  ;;  %v241_v41 = vshrl.u32 %v3714_v28, 16  ;;  %v3744_v57 = vld [vmem:[%s3680_s28 + $0x40] sm:$0xf] }
  0x25   : > { %v224_v35 = vrot.slane %v223_v24, 4  ;;  %v234_v36 = vrot.slane %v233_v25, 4  ;;  %v334_v38 = vrot.slane %v332_v27, 5  ;;  %v244_v42 = vshll.u32 %v3714_v28, 16  ;;  %v3752_v62 = vld [vmem:[%s3680_s28 + $0x44] sm:$0x1] }
  0x26   : > { %v319_v39 = vor.u32 %v318_v32, %v315_v31  ;;  %v250_v43 = vshll.u32 %v3717_v29, 16  ;;  %v329_v46 = vor.u32 %v328_v37, %v324_v33  ;;  %v254_v47 = vshrl.u32 %v3717_v29, 16  ;;  %v3758_v3 = vld [vmem:[%s3680_s28 + $0x18] sm:$0xf]  ;;  %v3765_v19 = vld [vmem:[%s3680_s28 + $0x1c] sm:$0xf] }
  0x27   : > { %v229_v44 = vsel %vm3721_vm4, %v224_v35, %v228_v18  ;;  %v239_v45 = vsel %vm3721_vm4, %v234_v36, %v238_v20  ;;  %v243_v50 = vrot.slane %v241_v41, 4  ;;  %v246_v51 = vrot.slane %v244_v42, 5  ;;  %v3771_v23 = vld [vmem:[%s3680_s28 + $0x20] sm:$0x1]  ;;  %v3778_v32 = vld [vmem:[%s3680_s28 + $0x48] sm:$0xf] }
  0x28   : > { %v2841_v48 = vcombine.low %v229_v44, %v239_v45  ;;  %v320_v49 = vrot.slane %v319_v39, 4  ;;  %v330_v53 = vrot.slane %v329_v46, 4  ;;  %v252_v54 = vrot.slane %v250_v43, 5  ;;  %v3789_v44 = vld [vmem:[%s3680_s28 + $0x4c] sm:$0xf]  ;;  %s2733_s16 = scalar_lea.sflag [#allocation3], %s175_s29 }
  0x29   : > { %v256_v55 = vrot.slane %v254_v47, 4  ;;  %v260_v56 = vshll.u32 %v3729_v40, 16  ;;  %v756_v58 = vrot.slane %v3689_v6, 5  ;;  %v247_v60 = vor.u32 %v246_v51, %v243_v50  ;;  %s3474_s21 = scalar_lea.vmem %s2749_s9, 32  ;;  %s3568_s15 = smov [#allocation2]  }
  0x2a   : > { %3206 = vmatprep.mubr.msk.bf16.mxu0 %vm434_vm3, %v2841_v48  ;;  %v325_v59 = vsel %vm3721_vm4, %v320_v49, %v324_v33  ;;  %v760_v61 = vrot.slane %v3717_v29, 5  ;;  %v335_v63 = vsel %vm3721_vm4, %v330_v53, %v334_v38  ;;  %v337_v2 = vshrl.u32 %v3740_v52, 16  ;;  %v3784_v38 = vld [vmem:[%s4789_s1 + $0x8] sm:$0x3]  ;;  %p3475_p13 = scmp.ne.s32.totalorder %s2749_s9, %s3474_s21  ;;  %s3478_s24 = sshll.u32 %s3568_s15, 4  ;;  %s3479_s24 = int_to_ptr.vmem [resolvable:$false] %s3478_s24 }
  0x2b   : > { %v257_v0 = vor.u32 %v256_v55, %v252_v54  ;;  %v262_v1 = vrot.slane %v260_v56, 5  ;;  %v2845_v7 = vcombine.low %v325_v59, %v335_v63  ;;  %v248_v8 = vrot.slane %v247_v60, 4  ;;  %v3802_v63 = vld [vmem:[%s3680_s28 + $0x24] sm:$0xf]  ;;  %s3480_s27 = scalar_lea.vmem %s3479_s24, 64  ;;  %p3481_p2 = scmp.lt.s32.totalorder %s2749_s9, %s3479_s24 }
  0x2c   : > { %v340_v9 = vshll.u32 %v3740_v52, 16  ;;  %v346_v10 = vshll.u32 %v3744_v57, 16  ;;  %v339_v16 = vrot.slane %v337_v2, 4  ;;  %v350_v17 = vshrl.u32 %v3744_v57, 16  ;;  %p3476_p0 = pnand %p3475_p13, %p3640_p3  ;;  %p3482_p4 = scmp.lt.s32.totalorder %s3480_s27, %s3474_s21 }
  0x2d   : > { %v258_v12 = vrot.slane %v257_v0, 4  ;;  %v356_v18 = vshll.u32 %v3752_v62, 16  ;;  %3214 = vmatprep.mubr.msk.bf16.mxu1 %vm434_vm3, %v2845_v7  ;;  %v253_v20 = vsel %vm3721_vm4, %v248_v8, %v252_v54  ;;  %v265_v24 = vshrl.u32 %v3758_v3, 16  ;;  %v3796_v54 = vld [vmem:[%s3680_s28 + $0x50] sm:$0x1] }
  0x2e   : > { %v342_v21 = vrot.slane %v340_v9, 5  ;;  %v348_v22 = vrot.slane %v346_v10, 5  ;;  %v352_v26 = vrot.slane %v350_v17, 4  ;;  %v268_v31 = vshll.u32 %v3758_v3, 16  ;;  %v3810_v7 = vld [vmem:[%s3680_s28 + $0x28] sm:$0xf]  ;;  %p3477_p1 = pneg %p3476_p0  ;;  %p3483_p5 = por %p3482_p4, %p3481_p2 }
  0x2f   : > { %v263_v25 = vsel %vm3721_vm4, %v258_v12, %v262_v1  ;;  %v358_v27 = vrot.slane %v356_v18, 5  ;;  %v267_v36 = vrot.slane %v265_v24, 4  ;;  %v274_v37 = vshll.u32 %v3765_v19, 16  ;;  %v3815_v8 = vld [vmem:[%s4789_s1 + $0x6] sm:$0x3] }
  0x30   : > { %v2842_v33 = vcombine.low %v253_v20, %v263_v25  ;;  %v343_v35 = vor.u32 %v342_v21, %v339_v16  ;;  %v353_v39 = vor.u32 %v352_v26, %v348_v22  ;;  %v270_v41 = vrot.slane %v268_v31, 5  ;;  %v3819_v17 = vld [vmem:[%s3680_s28 + $0x2c] sm:$0x1]  ;;  %v3825_v24 = vld [vmem:[%s3680_s28 + $0x54] sm:$0xf]  ;;  %p3484_p6 = pnand %p3483_p5, %p3477_p1 }
  0x31   : > { %v278_v42 = vshrl.u32 %v3765_v19, 16  ;;  %v284_v43 = vshll.u32 %v3771_v23, 16  ;;  %v276_v46 = vrot.slane %v274_v37, 5  ;;  %v361_v47 = vshrl.u32 %v3778_v32, 16 }
  0x32   : > { %3207 = vmatmul.mubr.msk.bf16.vlgmr.msra.gmra.mxu0 %vm434_vm3, %v2842_v33  ;;  %v344_v45 = vrot.slane %v343_v35, 4  ;;  %v364_v48 = vshll.u32 %v3778_v32, 16  ;;  %v354_v49 = vrot.slane %v353_v39, 4  ;;  %v271_v50 = vor.u32 %v270_v41, %v267_v36  ;;  %v3831_v33 = vld [vmem:[%s3680_s28 + $0x58] sm:$0xf] }
  0x33   : > { %3241 = vmatpush3.bf16.msra.mxu0 %v3726_v34  ;;  %v280_v51 = vrot.slane %v278_v42, 4  ;;  %v286_v53 = vrot.slane %v284_v43, 5  ;;  %v363_v56 = vrot.slane %v361_v47, 4  ;;  %v370_v60 = vshll.u32 %v3789_v44, 16 }
  0x34   : > { %v349_v55 = vsel %vm3721_vm4, %v344_v45, %v348_v22  ;;  %v366_v59 = vrot.slane %v364_v48, 5  ;;  %3373 = vmatprep.subr.msk.bf16.mxu0 %vm459_vm0, %v3784_v38  ;;  %v359_v34 = vsel %vm3721_vm4, %v354_v49, %v358_v27  ;;  %v272_v0 = vrot.slane %v271_v50, 4  ;;  %v724_v50 = vld [vmem:[%s3680_s28] sm:$0xe] }
  0x35   : > { %v281_v1 = vor.u32 %v280_v51, %v276_v46  ;;  %v374_v2 = vshrl.u32 %v3789_v44, 16  ;;  %v2846_v9 = vcombine.low %v349_v55, %v359_v34  ;;  %v372_v12 = vrot.slane %v370_v60, 5 }
  0x36   : > { %v367_v10 = vor.u32 %v366_v59, %v363_v56  ;;  %v380_v16 = vshll.u32 %v3796_v54, 16  ;;  %v277_v18 = vsel %vm3721_vm4, %v272_v0, %v276_v46  ;;  %v289_v22 = vshrl.u32 %v3802_v63, 16  ;;  %v3840_v46 = vld [vmem:[%s3680_s28 + $0x5c] sm:$0x1] }
  0x37   : > { %v282_v20 = vrot.slane %v281_v1, 4  ;;  %v376_v21 = vrot.slane %v374_v2, 4  ;;  %3215 = vmatmul.mubr.msk.bf16.vlgmr.msra.gmra.mxu1 %vm434_vm3, %v2846_v9  ;;  %v292_v27 = vshll.u32 %v3802_v63, 16  ;;  %v298_v31 = vshll.u32 %v3810_v7, 16 }
  0x38   : > { %v368_v25 = vrot.slane %v367_v10, 4  ;;  %v382_v26 = vrot.slane %v380_v16, 5  ;;  %3223 = vmatpush3.bf16.msra.mxu1 %v3706_v15  ;;  %v291_v37 = vrot.slane %v289_v22, 4  ;;  %v302_v39 = vshrl.u32 %v3810_v7, 16 }
  0x39   : > { %v287_v35 = vsel %vm3721_vm4, %v282_v20, %v286_v53  ;;  %v377_v36 = vor.u32 %v376_v21, %v372_v12  ;;  %v294_v43 = vrot.slane %v292_v27, 5  ;;  %v300_v45 = vrot.slane %v298_v31, 5  ;;  %3372 = vmatprep.subr.msk.bf16.mxu1 %vm459_vm0, %v3815_v8 }
  0x3a   : > { %v2843_v41 = vcombine.low %v277_v18, %v287_v35  ;;  %v373_v42 = vsel %vm3721_vm4, %v368_v25, %v372_v12  ;;  %v304_v15 = vrot.slane %v302_v39, 4  ;;  %v308_v48 = vshll.u32 %v3819_v17, 16  ;;  %v725_v12 = vld [vmem:[%s3680_s28 + $0xc] sm:$0xe] }
  0x3b   : > { %v378_v47 = vrot.slane %v377_v36, 4  ;;  %v385_v49 = vshrl.u32 %v3825_v24, 16  ;;  %v295_v51 = vor.u32 %v294_v43, %v291_v37  ;;  %v388_v53 = vshll.u32 %v3825_v24, 16 }
  0x3c   : > { %3210 = vmatprep.mubr.msk.bf16.mxu0 %vm434_vm3, %v2843_v41  ;;  %v394_v55 = vshll.u32 %v3831_v33, 16  ;;  %v398_v56 = vshrl.u32 %v3831_v33, 16  ;;  %v305_v60 = vor.u32 %v304_v15, %v300_v45  ;;  %v310_v34 = vrot.slane %v308_v48, 5  ;;  %v726_v41 = vld [vmem:[%s3680_s28 + $0x18] sm:$0xe] }
  0x3d   : > { %v383_v59 = vsel %vm3721_vm4, %v378_v47, %v382_v26  ;;  %v387_v0 = vrot.slane %v385_v49, 4  ;;  %v296_v2 = vrot.slane %v295_v51, 4  ;;  %v390_v9 = vrot.slane %v388_v53, 5 }
  0x3e   : > { %v2847_v1 = vcombine.low %v373_v42, %v383_v59  ;;  %v396_v10 = vrot.slane %v394_v55, 5  ;;  %v306_v16 = vrot.slane %v305_v60, 4  ;;  %v400_v18 = vrot.slane %v398_v56, 4  ;;  %v728_v55 = vld [vmem:[%s3680_s28 + $0x30] sm:$0xe] }
  0x3f   : > { %v404_v20 = vshll.u32 %v3840_v46, 16  ;;  %v2873_v22 = vrot.slane %v724_v50, 9  ;;  %v763_v25 = vrot.slane %v3729_v40, 5  ;;  %v301_v26 = vsel %vm3721_vm4, %v296_v2, %v300_v45 }
  0x40   : > { %3218 = vmatprep.mubr.msk.bf16.mxu1 %vm434_vm3, %v2847_v1  ;;  %v391_v27 = vor.u32 %v390_v9, %v387_v0  ;;  %v753_v31 = vrot.slane %v3686_v5, 5  ;;  %v311_v35 = vsel %vm3721_vm4, %v306_v16, %v310_v34  ;;  %v401_v36 = vor.u32 %v400_v18, %v396_v10  ;;  %v3025_v1 = vld [vmem:[%s4789_s1 + $0xc] sm:$0x3] }
  0x41   : > { %v406_v37 = vrot.slane %v404_v20, 5  ;;  %v2874_v39 = vrot.slane %v725_v12, 9  ;;  %v2844_v42 = vcombine.low %v301_v26, %v311_v35  ;;  %v2857_v45 = vcombine.low %v3683_v4, %v3686_v5  ;;  %v727_v5 = vld [vmem:[%s3680_s28 + $0x24] sm:$0xe]  ;;  %v729_v12 = vld [vmem:[%s3680_s28 + $0x3c] sm:$0xe] }
  0x42   : > { %v392_v43 = vrot.slane %v391_v27, 4  ;;  %v754_v40 = vsel %vm3857_vm7, %v2873_v22, %v753_v31  ;;  %v755_v47 = vrot.slane %v753_v31, 4  ;;  %v402_v15 = vrot.slane %v401_v36, 4 }
  0x43   : > { %v761_v48 = vsel %vm3857_vm7, %v2874_v39, %v760_v61  ;;  %v762_v49 = vrot.slane %v760_v61, 4  ;;  %3211 = vmatmul.mubr.msk.bf16.gmra.mxu0 %vm434_vm3, %v2844_v42  ;;  %v2875_v53 = vrot.slane %v726_v41, 9  ;;  %v767_v4 = vrot.slane %v3765_v19, 5  ;;  %v730_v41 = vld [vmem:[%s3680_s28 + $0x48] sm:$0xe] }
  0x44   : > { %v397_v50 = vsel %vm3721_vm4, %v392_v43, %v396_v10  ;;  %v757_v51 = vsel %vm3857_vm7, %v755_v47, %v756_v58  ;;  %v407_v56 = vsel %vm3721_vm4, %v402_v15, %v406_v37  ;;  %v770_v60 = vrot.slane %v3771_v23, 5  ;;  %v3935_v42 = vld [vmem:[%s3680_s28 + $0x54] sm:$0xe]  ;;  %v2933_v43 = vld [vmem:[%s3680_s28 + $0xc] sm:$0xf] }
  0x45   : > { %v2882_v61 = vcombine.low %v754_v40, %v757_v51  ;;  %v764_v59 = vsel %vm3857_vm7, %v762_v49, %v763_v25  ;;  %v2848_v34 = vcombine.low %v397_v50, %v407_v56  ;;  %v1060_v6 = vsel %vm459_vm0, %v3815_v8, 0  ;;  %v3955_v49 = vld [vmem:[%s4789_s1 + $0xa] sm:$0x3] }
  0x46   : > { %v768_v58 = vsel %vm3857_vm7, %v2875_v53, %v767_v4  ;;  %v769_v0 = vrot.slane %v767_v4, 4  ;;  %v784_v2 = vrot.slane %v3703_v14, 5  ;;  %v2876_v9 = vrot.slane %v727_v5, 9  ;;  %v2936_v5 = vld [vmem:[%s3680_s28 + $0x18] sm:$0xf] }
  0x47   : > { %3242 = vmatprep.mubr.msk.bf16.mxu0 %vm434_vm3, %v2882_v61  ;;  %v774_v10 = vrot.slane %v3810_v7, 5  ;;  %v777_v23 = vrot.slane %v3819_v17, 5  ;;  %3219 = vmatmul.mubr.msk.bf16.gmra.mxu1 %vm434_vm3, %v2848_v34  ;;  %v2883_v8 = vcombine.low %v761_v48, %v764_v59  ;;  %v2877_v18 = vrot.slane %v728_v55, 9  ;;  %v3950_v48 = vld [vmem:[%s3680_s28 + $0x14] sm:$0x1] }
  0x48   : > { %v771_v16 = vsel %vm3857_vm7, %v769_v0, %v770_v60  ;;  %v781_v20 = vrot.slane %v3700_v13, 5  ;;  %3224 = vmatprep.mubr.msk.bf16.mxu1 %vm434_vm3, %v2857_v45  ;;  %v1442_v14 = vsel %vm459_vm0, %v3784_v38, 0  ;;  %v3914_v17 = vsel %vm459_vm0, %v3025_v1, 0  ;;  %v3966_v60 = vld [vmem:[%s3680_s28 + $0x1c] sm:$0xf] }
  0x49   : > { %v2884_v22 = vcombine.low %v768_v58, %v771_v16  ;;  %v776_v25 = vrot.slane %v774_v10, 4  ;;  %v2858_v26 = vcombine.low %v3714_v28, %v3717_v29  ;;  %v2878_v31 = vrot.slane %v729_v12, 9 }
  0x4a   : > { %v783_v27 = vrot.slane %v781_v20, 4  ;;  %v788_v35 = vrot.slane %v3744_v57, 5  ;;  %v2859_v36 = vcombine.low %v3758_v3, %v3765_v19  ;;  %v775_v38 = vsel %vm3857_vm7, %v2876_v9, %v774_v10 }
  0x4b   : > { %v778_v37 = vsel %vm3857_vm7, %v776_v25, %v777_v23  ;;  %v782_v39 = vsel %vm3857_vm7, %v2877_v18, %v781_v20  ;;  %3243 = vmatmul.mubr.msk.bf16.vlgmr.msra.gmra.mxu0 %vm434_vm3, %v2883_v8  ;;  %v2860_v28 = vcombine.low %v3802_v63, %v3810_v7  ;;  %v791_v19 = vrot.slane %v3752_v62, 5  ;;  %v3947_v62 = vld [vmem:[%s3680_s28 + $0x10] sm:$0xf] }
  0x4c   : > { %v785_v29 = vsel %vm3857_vm7, %v783_v27, %v784_v2  ;;  %v790_v3 = vrot.slane %v788_v35, 4  ;;  %3277 = vmatpush3.bf16.msra.mxu0 %v1442_v14  ;;  %3246 = vmatprep.mubr.msk.bf16.mxu0 %vm434_vm3, %v2884_v22  ;;  %v2861_v40 = vcombine.low %v3696_v11, %v3700_v13  ;;  %v2862_v47 = vcombine.low %v3740_v52, %v3744_v57  ;;  %v2939_v2 = vld [vmem:[%s3680_s28 + $0x24] sm:$0xf]  ;;  %v3989_v22 = vld [vmem:[%s3680_s28 + $0x20] sm:$0x1] }
  0x4d   : > { %v2863_v15 = vcombine.low %v3778_v32, %v3789_v44  ;;  %v795_v45 = vrot.slane %v3789_v44, 5  ;;  %v2885_v50 = vcombine.low %v775_v38, %v778_v37  ;;  %v2886_v51 = vcombine.low %v782_v39, %v785_v29  ;;  %3375 = vmatprep.subr.msk.bf16.mxu0 %vm459_vm0, %v3025_v1  ;;  %v2945_v13 = vld [vmem:[%s3680_s28 + $0x3c] sm:$0xf]  ;;  %v4062_v57 = vld [vmem:[%s3680_s28 + $0x4c] sm:$0xf] }
  0x4e   : > { %v3959_v53 = vsel %vm3857_vm7, %v2878_v31, %v788_v35  ;;  %v2879_v4 = vrot.slane %v730_v41, 9  ;;  %v798_v56 = vrot.slane %v3796_v54, 5  ;;  %v802_v61 = vrot.slane %v3831_v33, 5  ;;  %v3995_v35 = vld [vmem:[%s3680_s28 + $0x28] sm:$0xf] }
  0x4f   : > { %v797_v55 = vrot.slane %v795_v45, 4  ;;  %v1200_v59 = vshrl.u32 %v2933_v43, 16  ;;  %3225 = vmatmul.mubr.msk.bf16.vlgmr.msra.gmra.mxu1 %vm434_vm3, %v2858_v26  ;;  %v3971_v34 = vsel %vm3857_vm7, %v790_v3, %v791_v19  ;;  %v2864_v58 = vcombine.low %v3825_v24, %v3831_v33 }
  0x50   : > { %v1203_v0 = vshll.u32 %v2933_v43, 16  ;;  %v1209_v1 = vshll.u32 %v3947_v62, 16  ;;  %3259 = vmatpush3.bf16.msra.mxu1 %v1060_v6  ;;  %3228 = vmatprep.mubr.msk.bf16.mxu1 %vm434_vm3, %v2859_v36  ;;  %v2880_v54 = vrot.slane %v3935_v42, 9  ;;  %v1213_v10 = vshrl.u32 %v3947_v62, 16  ;;  %v4001_v42 = vld [vmem:[%s3680_s28 + $0x2c] sm:$0x1] }
  0x51   : > { %v1202_v9 = vrot.slane %v1200_v59, 4  ;;  %v1219_v23 = vshll.u32 %v3950_v48, 16  ;;  %v796_v12 = vsel %vm3857_vm7, %v2879_v4, %v795_v45  ;;  %v805_v8 = vrot.slane %v3840_v46, 5  ;;  %3374 = vmatprep.subr.msk.bf16.mxu1 %vm459_vm0, %v3955_v49 }
  0x52   : > { %v1205_v16 = vrot.slane %v1203_v0, 5  ;;  %v1211_v18 = vrot.slane %v1209_v1, 5  ;;  %v799_v6 = vsel %vm3857_vm7, %v797_v55, %v798_v56  ;;  %v804_v20 = vrot.slane %v802_v61, 4 }
  0x53   : > { %v1215_v14 = vrot.slane %v1213_v10, 4  ;;  %v1224_v25 = vshrl.u32 %v2936_v5, 16  ;;  %3247 = vmatmul.mubr.msk.bf16.gmra.mxu0 %vm434_vm3, %v2885_v50  ;;  %v1227_v27 = vshll.u32 %v2936_v5, 16  ;;  %v1233_v46 = vshll.u32 %v3966_v60, 16  ;;  %v2942_v5 = vld [vmem:[%s3680_s28 + $0x30] sm:$0xf] }
  0x54   : > { %v1206_v26 = vor.u32 %v1205_v16, %v1202_v9  ;;  %v1237_v31 = vshrl.u32 %v3966_v60, 16  ;;  %3250 = vmatprep.mubr.msk.bf16.mxu0 %vm434_vm3, %v2886_v51  ;;  %v1221_v38 = vrot.slane %v1219_v23, 5  ;;  %v1248_v39 = vshrl.u32 %v2939_v2, 16  ;;  %v4034_v9 = vld [vmem:[%s3680_s28 + $0x38] sm:$0x1] }
  0x55   : > { %v1216_v36 = vor.u32 %v1215_v14, %v1211_v18  ;;  %v1226_v37 = vrot.slane %v1224_v25, 4  ;;  %v1229_v29 = vrot.slane %v1227_v27, 5  ;;  %v3998_v3 = vrot.slane %v1233_v46, 5  ;;  %v4041_v25 = vld [vmem:[%s3680_s28 + $0x40] sm:$0xf] }
  0x56   : > { %v1207_v41 = vrot.slane %v1206_v26, 4  ;;  %v1239_v19 = vrot.slane %v1237_v31, 4  ;;  %v2887_v43 = vcombine.low %v3959_v53, %v3971_v34  ;;  %v1250_v50 = vrot.slane %v1248_v39, 4  ;;  %v4022_v34 = vld [vmem:[%s3680_s28 + $0x34] sm:$0xf] }
  0x57   : > { %v1217_v45 = vrot.slane %v1216_v36, 4  ;;  %v1251_v4 = vshll.u32 %v2939_v2, 16  ;;  %3229 = vmatmul.mubr.msk.bf16.gmra.mxu1 %vm434_vm3, %v2860_v28  ;;  %v2888_v51 = vcombine.low %v796_v12, %v799_v6  ;;  %v803_v55 = vsel %vm3857_vm7, %v2880_v54, %v802_v61  ;;  %v4047_v36 = vld [vmem:[%s3680_s28 + $0x44] sm:$0x1] }
  0x58   : > { %v1243_v56 = vshll.u32 %v3989_v22, 16  ;;  %v1257_v59 = vshll.u32 %v3995_v35, 16  ;;  %3232 = vmatprep.mubr.msk.bf16.mxu1 %vm434_vm3, %v2861_v40  ;;  %v806_v63 = vsel %vm3857_vm7, %v804_v20, %v805_v8  ;;  %v1230_v7 = vor.u32 %v1229_v29, %v1226_v37 }
  0x59   : > { %v1253_v53 = vrot.slane %v1251_v4, 5  ;;  %v1261_v28 = vshrl.u32 %v3995_v35, 16  ;;  %v1212_v61 = vsel %vm3721_vm4, %v1207_v41, %v1211_v18  ;;  %v1222_v0 = vsel %vm3721_vm4, %v1217_v45, %v1221_v38 }
  0x5a   : > { %v1240_v1 = vor.u32 %v1239_v19, %v3998_v3  ;;  %v4029_v11 = vrot.slane %v1257_v59, 5  ;;  %v1267_v54 = vshll.u32 %v4001_v42, 16  ;;  %v1272_v10 = vshrl.u32 %v2942_v5, 16 }
  0x5b   : > { %v1254_v40 = vor.u32 %v1253_v53, %v1250_v50  ;;  %v1263_v2 = vrot.slane %v1261_v28, 4  ;;  %3251 = vmatmul.mubr.msk.bf16.gmra.mxu0 %vm434_vm3, %v2887_v43  ;;  %v2889_v23 = vcombine.low %v803_v55, %v806_v63  ;;  %v1245_v12 = vrot.slane %v1243_v56, 5  ;;  %v2948_v50 = vld [vmem:[%s3680_s28 + $0x48] sm:$0xf] }
  0x5c   : > { %v1275_v8 = vshll.u32 %v2942_v5, 16  ;;  %v1281_v16 = vshll.u32 %v4022_v34, 16  ;;  %3254 = vmatprep.mubr.msk.bf16.mxu0 %vm434_vm3, %v2888_v51  ;;  %v2958_v18 = vcombine.low %v1212_v61, %v1222_v0  ;;  %v1231_v6 = vrot.slane %v1230_v7, 4  ;;  %v3458_v61 = vld [vmem:[%s3680_s28 + $0xc] sm:$0xff]  }
  0x5d   : > { %v1264_v20 = vor.u32 %v1263_v2, %v4029_v11  ;;  %v1274_v14 = vrot.slane %v1272_v10, 4  ;;  %v1241_v26 = vrot.slane %v1240_v1, 4  ;;  %v1285_v31 = vshrl.u32 %v4022_v34, 16  ;;  %v2951_v2 = vld [vmem:[%s3680_s28 + $0x54] sm:$0xf] }
  0x5e   : > { %v1277_v27 = vrot.slane %v1275_v8, 5  ;;  %v4043_v46 = vrot.slane %v1281_v16, 5  ;;  %v1255_v38 = vrot.slane %v1254_v40, 4  ;;  %v1269_v37 = vrot.slane %v1267_v54, 5 }
  0x5f   : > { %v1296_v39 = vshrl.u32 %v2945_v13, 16  ;;  %v1299_v41 = vshll.u32 %v2945_v13, 16  ;;  %3233 = vmatmul.mubr.msk.bf16.gmra.mxu1 %vm434_vm3, %v2862_v47  ;;  %v1265_v29 = vrot.slane %v1264_v20, 4  ;;  %v1287_v19 = vrot.slane %v1285_v31, 4 }
  0x60   : > { %v1291_v43 = vshll.u32 %v4034_v9, 16  ;;  %v1305_v45 = vshll.u32 %v4041_v25, 16  ;;  %3236 = vmatprep.mubr.msk.bf16.mxu1 %vm434_vm3, %v2863_v15  ;;  %v1278_v4 = vor.u32 %v1277_v27, %v1274_v14  ;;  %v1309_v52 = vshrl.u32 %v4041_v25, 16 }
  0x61   : > { %v1298_v5 = vrot.slane %v1296_v39, 4  ;;  %v1301_v51 = vrot.slane %v1299_v41, 5  ;;  %v1236_v47 = vsel %vm3721_vm4, %v1231_v6, %v3998_v3  ;;  %v1246_v55 = vsel %vm3721_vm4, %v1241_v26, %v1245_v12  ;;  %v4086_v12 = vld [vmem:[%s3680_s28 + $0x58] sm:$0xf]  ;;  %v4104_v39 = vld [vmem:[%s3680_s28 + $0x5c] sm:$0x1] }
  0x62   : > { %v1288_v56 = vor.u32 %v1287_v19, %v4043_v46  ;;  %v4070_v32 = vrot.slane %v1305_v45, 5  ;;  %v1311_v15 = vrot.slane %v1309_v52, 4  ;;  %v1315_v59 = vshll.u32 %v4047_v36, 16  ;;  %v3459_v52 = vld [vmem:[%s3680_s28 + $0x18] sm:$0xff]  }
  0x63   : > { %v1302_v44 = vor.u32 %v1301_v51, %v1298_v5  ;;  %v1320_v63 = vshrl.u32 %v2948_v50, 16  ;;  %3255 = vmatmul.mubr.msk.bf16.gmra.mxu0 %vm434_vm3, %v2889_v23  ;;  %v1260_v3 = vsel %vm3721_vm4, %v1255_v38, %v4029_v11  ;;  %v1270_v7 = vsel %vm3721_vm4, %v1265_v29, %v1269_v37  ;;  %v4121_v51 = vld [vmem:[%s4789_s1 + $0x10] sm:$0x3] }
  0x64   : > { %v1323_v53 = vshll.u32 %v2948_v50, 16  ;;  %v1329_v28 = vshll.u32 %v4062_v57, 16  ;;  %3278 = vmatprep.mubr.msk.bf16.mxu0 %vm434_vm3, %v2958_v18  ;;  %v1279_v0 = vrot.slane %v1278_v4, 4  ;;  %v1289_v1 = vrot.slane %v1288_v56, 4  ;;  %v4089_v18 = vld [vmem:[%s3680_s28 + $0x50] sm:$0x1] }
  0x65   : > { %v1293_v13 = vrot.slane %v1291_v43, 5  ;;  %v1312_v40 = vor.u32 %v1311_v15, %v4070_v32  ;;  %v1303_v54 = vrot.slane %v1302_v44, 4  ;;  %v1322_v10 = vrot.slane %v1320_v63, 4  ;;  %v4114_v43 = vld [vmem:[%s3680_s28 + $0x64] sm:$0xf] }
  0x66   : > { %v1325_v23 = vrot.slane %v1323_v53, 5  ;;  %v1333_v11 = vshrl.u32 %v4062_v57, 16  ;;  %v2959_v8 = vcombine.low %v1236_v47, %v1246_v55  ;;  %v2960_v16 = vcombine.low %v1260_v3, %v1270_v7  ;;  %v3460_v44 = vld [vmem:[%s3680_s28 + $0x24] sm:$0xff]  }
  0x67   : > { %v1313_v6 = vrot.slane %v1312_v40, 4  ;;  %v1317_v20 = vrot.slane %v1315_v59, 5  ;;  %3237 = vmatmul.mubr.msk.bf16.gmra.mxu1 %vm434_vm3, %v2864_v58  ;;  %v4095_v14 = vrot.slane %v1329_v28, 5  ;;  %v1344_v27 = vshrl.u32 %v2951_v2, 16  ;;  %v2954_v58 = vld [vmem:[%s3680_s28 + $0x60] sm:$0xf] }
  0x68   : > { %v1335_v26 = vrot.slane %v1333_v11, 4  ;;  %v1347_v31 = vshll.u32 %v2951_v2, 16  ;;  %3260 = vmatprep.mubr.msk.bf16.mxu1 %vm434_vm3, %v3458_v61  ;;  %v1284_v38 = vsel %vm3721_vm4, %v1279_v0, %v4043_v46  ;;  %v1294_v37 = vsel %vm3721_vm4, %v1289_v1, %v1293_v13  ;;  %v3066_v0 = vld [vmem:[%s4789_s1 + $0xe] sm:$0x3]  ;;  %v4142_v11 = vld [vmem:[%s3680_s28 + $0x68] sm:$0x1] }
  0x69   : > { %v1353_v24 = vshll.u32 %v4086_v12, 16  ;;  %v1357_v33 = vshrl.u32 %v4086_v12, 16  ;;  %v1308_v41 = vsel %vm3721_vm4, %v1303_v54, %v4070_v32  ;;  %v1326_v29 = vor.u32 %v1325_v23, %v1322_v10 }
  0x6a   : > { %v1339_v19 = vshll.u32 %v4089_v18, 16  ;;  %v1346_v46 = vrot.slane %v1344_v27, 4  ;;  %v1318_v45 = vsel %vm3721_vm4, %v1313_v6, %v1317_v20  ;;  %v1349_v50 = vrot.slane %v1347_v31, 5 }
  0x6b   : > { %v1355_v4 = vrot.slane %v1353_v24, 5  ;;  %v1359_v5 = vrot.slane %v1357_v33, 4  ;;  %3279 = vmatmul.mubr.msk.bf16.vlgmr.msra.gmra.mxu0 %vm434_vm3, %v2959_v8  ;;  %v1336_v47 = vor.u32 %v1335_v26, %v4095_v14  ;;  %v1363_v55 = vshll.u32 %v4104_v39, 16  ;;  %v3461_v8 = vld [vmem:[%s3680_s28 + $0x30] sm:$0xff]   ;;  %v3462_v26 = vld [vmem:[%s3680_s28 + $0x3c] sm:$0xff]  }
  0x6c   : > { %v1368_v56 = vshrl.u32 %v2954_v58, 16  ;;  %v1371_v32 = vshll.u32 %v2954_v58, 16  ;;  %3313 = vmatpush3.bf16.msra.mxu0 %v3914_v17  ;;  %3282 = vmatprep.mubr.msk.bf16.mxu0 %vm434_vm3, %v2960_v16  ;;  %v1350_v15 = vor.u32 %v1349_v50, %v1346_v46  ;;  %v1377_v63 = vshll.u32 %v4114_v43, 16  ;;  %v2974_v33 = vld [vmem:[%s3680_s28 + $0xc] sm:$0xe] }
  0x6d   : > { %v1360_v59 = vor.u32 %v1359_v5, %v1355_v4  ;;  %v1696_v3 = vsel %vm459_vm0, %v3955_v49, 0  ;;  %v1381_v7 = vshrl.u32 %v4114_v43, 16  ;;  %3377 = vmatprep.subr.msk.bf16.mxu0 %vm459_vm0, %v4121_v51  ;;  %v2961_v53 = vcombine.low %v1284_v38, %v1294_v37  ;;  %v2975_v46 = vld [vmem:[%s3680_s28 + $0x18] sm:$0xe]  ;;  %v3463_v5 = vld [vmem:[%s3680_s28 + $0x48] sm:$0xff]  }
  0x6e   : > { %v2962_v28 = vcombine.low %v1308_v41, %v1318_v45  ;;  %v1327_v61 = vrot.slane %v1326_v29, 4  ;;  %v1341_v17 = vrot.slane %v1339_v19, 5  ;;  %v1337_v1 = vrot.slane %v1336_v47, 4 }
  0x6f   : > { %3261 = vmatmul.mubr.msk.bf16.vlgmr.msra.gmra.mxu1 %vm434_vm3, %v3459_v52  ;;  %v1365_v13 = vrot.slane %v1363_v55, 5  ;;  %v1370_v49 = vrot.slane %v1368_v56, 4  ;;  %v1373_v40 = vrot.slane %v1371_v32, 5  ;;  %v1351_v2 = vrot.slane %v1350_v15, 4  ;;  %v3464_v56 = vld [vmem:[%s3680_s28 + $0x54] sm:$0xff]  }
  0x70   : > { %3295 = vmatpush3.bf16.msra.mxu1 %v1696_v3  ;;  %3264 = vmatprep.mubr.msk.bf16.mxu1 %vm434_vm3, %v3460_v44  ;;  %v1361_v54 = vrot.slane %v1360_v59, 4  ;;  %v1379_v10 = vrot.slane %v1377_v63, 5  ;;  %v1383_v23 = vrot.slane %v1381_v7, 4  ;;  %v1332_v16 = vsel %vm3721_vm4, %v1327_v61, %v4095_v14  ;;  %v2977_v63 = vld [vmem:[%s3680_s28 + $0x30] sm:$0xe] }
  0x71   : > { %3376 = vmatprep.subr.msk.bf16.mxu1 %vm459_vm0, %v3066_v0  ;;  %v1342_v6 = vsel %vm3721_vm4, %v1337_v1, %v1341_v17  ;;  %v1374_v20 = vor.u32 %v1373_v40, %v1370_v49  ;;  %v1356_v27 = vsel %vm3721_vm4, %v1351_v2, %v1355_v4  ;;  %v1387_v37 = vshll.u32 %v4142_v11, 16  ;;  %v2976_v4 = vld [vmem:[%s3680_s28 + $0x24] sm:$0xe]  ;;  %v2978_v7 = vld [vmem:[%s3680_s28 + $0x3c] sm:$0xe] }
  0x72   : > { %v1366_v31 = vsel %vm3721_vm4, %v1361_v54, %v1365_v13  ;;  %v1384_v38 = vor.u32 %v1383_v23, %v1379_v10  ;;  %v2963_v14 = vcombine.low %v1332_v16, %v1342_v6  ;;  %v1591_v58 = vrot.slane %v3947_v62, 5  ;;  %v2979_v13 = vld [vmem:[%s3680_s28 + $0x48] sm:$0xe]  ;;  %v3042_v49 = vld [vmem:[%s3680_s28 + $0x18] sm:$0xf]  ;;  %v3465_v6 = vld [vmem:[%s3680_s28 + $0x60] sm:$0xff]  }
  0x73   : > { %3283 = vmatmul.mubr.msk.bf16.gmra.mxu0 %vm434_vm3, %v2961_v53  ;;  %v2964_v24 = vcombine.low %v1356_v27, %v1366_v31  ;;  %v1375_v41 = vrot.slane %v1374_v20, 4  ;;  %v1389_v19 = vrot.slane %v1387_v37, 5  ;;  %v1598_v45 = vrot.slane %v3966_v60, 5 }
  0x74   : > { %3286 = vmatprep.mubr.msk.bf16.mxu0 %vm434_vm3, %v2962_v28  ;;  %v1385_v29 = vrot.slane %v1384_v38, 4  ;;  %v1605_v50 = vrot.slane %v3995_v35, 5  ;;  %v2982_v52 = vrot.slane %v2974_v33, 9  ;;  %v1593_v47 = vrot.slane %v1591_v58, 4 }
  0x75   : > { %v1594_v62 = vrot.slane %v3950_v48, 5  ;;  %v2983_v55 = vrot.slane %v2975_v46, 9  ;;  %v1380_v32 = vsel %vm3721_vm4, %v1375_v41, %v1379_v10  ;;  %v1600_v35 = vrot.slane %v1598_v45, 4  ;;  %v4212_v10 = vld [vmem:[%s3680_s28 + $0x1c] sm:$0xf] }
  0x76   : > { %v1390_v60 = vsel %vm3721_vm4, %v1385_v29, %v1389_v19  ;;  %v1601_v44 = vrot.slane %v3989_v22, 5  ;;  %v2984_v15 = vrot.slane %v2976_v4, 9  ;;  %v1607_v59 = vrot.slane %v1605_v50, 4  ;;  %v3045_v29 = vld [vmem:[%s3680_s28 + $0x24] sm:$0xf]  ;;  %v3468_v4 = vld [vmem:[%s3680_s28 + $0x30] sm:$0xff]  }
  0x77   : > { %3265 = vmatmul.mubr.msk.bf16.gmra.mxu1 %vm434_vm3, %v3461_v8  ;;  %v1608_v48 = vrot.slane %v4001_v42, 5  ;;  %v1612_v3 = vrot.slane %v4022_v34, 5  ;;  %v2965_v53 = vcombine.low %v1380_v32, %v1390_v60  ;;  %v1592_v28 = vsel %vm3857_vm7, %v2982_v52, %v1591_v58  ;;  %v3466_v42 = vld [vmem:[%s3680_s28 + $0x18] sm:$0xff]  }
  0x78   : > { %3268 = vmatprep.mubr.msk.bf16.mxu1 %vm434_vm3, %v3462_v26  ;;  %v1595_v22 = vsel %vm3857_vm7, %v1593_v47, %v1594_v62  ;;  %v4187_v61 = vsel %vm459_vm0, %v3066_v0, 0  ;;  %v4193_v34 = vsel %vm3857_vm7, %v2983_v55, %v1598_v45  ;;  %v4197_v17 = vsel %vm3857_vm7, %v1600_v35, %v1601_v44  ;;  %v4256_v55 = vld [vmem:[%s3680_s28 + $0x28] sm:$0xf] }
  0x79   : > { %v2534_v1 = vsel %vm459_vm0, %v4121_v51, 0  ;;  %v4205_v0 = vsel %vm3857_vm7, %v2984_v15, %v1605_v50  ;;  %v4209_v40 = vsel %vm3857_vm7, %v1607_v59, %v1608_v48  ;;  %v2985_v2 = vrot.slane %v2977_v63, 9  ;;  %v3044_v15 = vld [vmem:[%s3680_s28 + $0x20] sm:$0x1] }
  0x7a   : > { %v2986_v54 = vrot.slane %v2978_v7, 9  ;;  %v2991_v23 = vcombine.low %v1592_v28, %v1595_v22  ;;  %v1614_v8 = vrot.slane %v1612_v3, 4  ;;  %v1615_v16 = vrot.slane %v4034_v9, 5 }
  0x7b   : > { %3287 = vmatmul.mubr.msk.bf16.gmra.mxu0 %vm434_vm3, %v2963_v14  ;;  %v1619_v51 = vrot.slane %v4041_v25, 5  ;;  %v2992_v20 = vcombine.low %v4193_v34, %v4197_v17  ;;  %v2987_v26 = vrot.slane %v2979_v13, 9  ;;  %v2038_v27 = vshrl.u32 %v3042_v49, 16  ;;  %v2980_v25 = vld [vmem:[%s3680_s28 + $0x54] sm:$0xe] }
  0x7c   : > { %3290 = vmatprep.mubr.msk.bf16.mxu0 %vm434_vm3, %v2964_v24  ;;  %v2041_v31 = vshll.u32 %v3042_v49, 16  ;;  %v2993_v38 = vcombine.low %v4205_v0, %v4209_v40  ;;  %v1622_v9 = vrot.slane %v4047_v36, 5  ;;  %v2047_v37 = vshll.u32 %v4212_v10, 16  ;;  %v3467_v36 = vld [vmem:[%s3680_s28 + $0x24] sm:$0xff]  }
  0x7d   : > { %v2051_v14 = vshrl.u32 %v4212_v10, 16  ;;  %v4229_v24 = vsel %vm3857_vm7, %v2985_v2, %v1612_v3  ;;  %v4233_v33 = vsel %vm3857_vm7, %v2986_v54, %v1619_v51  ;;  %v1626_v58 = vrot.slane %v4062_v57, 5  ;;  %v3084_v17 = vld [vmem:[%s3680_s28 + $0x24] sm:$0xe] }
  0x7e   : > { %v1633_v41 = vrot.slane %v4086_v12, 5  ;;  %v4241_v19 = vsel %vm3857_vm7, %v1614_v8, %v1615_v16  ;;  %v1621_v46 = vrot.slane %v1619_v51, 4  ;;  %v1629_v45 = vrot.slane %v4089_v18, 5 }
  0x7f   : > { %3269 = vmatmul.mubr.msk.bf16.gmra.mxu1 %vm434_vm3, %v3463_v5  ;;  %v1640_v50 = vrot.slane %v4114_v43, 5  ;;  %v4249_v57 = vsel %vm3857_vm7, %v2987_v26, %v1626_v58  ;;  %v2988_v12 = vrot.slane %v2980_v25, 9  ;;  %v2981_v5 = vld [vmem:[%s3680_s28 + $0x60] sm:$0xe]  ;;  %v2040_v52 = vrot.slane %v2038_v27, 4 }
  0x80   : > { %3272 = vmatprep.mubr.msk.bf16.mxu1 %vm434_vm3, %v3464_v56  ;;  %v2043_v47 = vrot.slane %v2041_v31, 5  ;;  %v4253_v62 = vrot.slane %v2047_v37, 5  ;;  %v2053_v18 = vrot.slane %v2051_v14, 4  ;;  %v2062_v43 = vshrl.u32 %v3045_v29, 16  ;;  %v3048_v26 = vld [vmem:[%s3680_s28 + $0x30] sm:$0xf] }
  0x81   : > { %v2065_v56 = vshll.u32 %v3045_v29, 16  ;;  %v2994_v32 = vcombine.low %v4229_v24, %v4241_v19  ;;  %v1628_v60 = vrot.slane %v1626_v58, 4  ;;  %v1635_v35 = vrot.slane %v1633_v41, 4  ;;  %v4301_v27 = vld [vmem:[%s3680_s28 + $0x34] sm:$0xf]  ;;  %v3469_v31 = vld [vmem:[%s3680_s28 + $0x3c] sm:$0xff]  }
  0x82   : > { %v1636_v44 = vrot.slane %v4104_v39, 5  ;;  %v4264_v59 = vsel %vm3857_vm7, %v1621_v46, %v1622_v9  ;;  %v2989_v48 = vrot.slane %v2981_v5, 9  ;;  %v1642_v63 = vrot.slane %v1640_v50, 4 }
  0x83   : > { %3291 = vmatmul.mubr.msk.bf16.gmra.mxu0 %vm434_vm3, %v2965_v53  ;;  %v1643_v3 = vrot.slane %v4142_v11, 5  ;;  %v2044_v7 = vor.u32 %v2043_v47, %v2040_v52  ;;  %v3083_v53 = vld [vmem:[%s3680_s28 + $0x18] sm:$0xe]  ;;  %v2429_v28 = vrot.slane %v4212_v10, 5  ;;  %v2071_v22 = vshll.u32 %v4256_v55, 16 }
  0x84   : > { %3314 = vmatprep.mubr.msk.bf16.mxu0 %vm434_vm3, %v3466_v42  ;;  %v2075_v39 = vshrl.u32 %v4256_v55, 16  ;;  %v2054_v42 = vor.u32 %v2053_v18, %v4253_v62  ;;  %v2057_v11 = vshll.u32 %v3044_v15, 16  ;;  %v2064_v13 = vrot.slane %v2062_v43, 4  ;;  %v3051_v52 = vld [vmem:[%s3680_s28 + $0x3c] sm:$0xf] }
  0x85   : > { %v2067_v49 = vrot.slane %v2065_v56, 5  ;;  %v2995_v2 = vcombine.low %v4233_v33, %v4264_v59  ;;  %v4278_v54 = vsel %vm3857_vm7, %v1628_v60, %v1629_v45  ;;  %v4282_v10 = vsel %vm3857_vm7, %v2988_v12, %v1633_v41  ;;  %v3470_v33 = vld [vmem:[%s3680_s28 + $0x48] sm:$0xff]   ;;  %v3050_v60 = vld [vmem:[%s3680_s28 + $0x38] sm:$0x1] }
  0x86   : > { %v4293_v8 = vsel %vm3857_vm7, %v2989_v48, %v1640_v50  ;;  %v4297_v16 = vsel %vm3857_vm7, %v1642_v63, %v1643_v3  ;;  %v3091_v51 = vrot.slane %v3083_v53, 9  ;;  %v2045_v9 = vrot.slane %v2044_v7, 4  ;;  %v3085_v48 = vld [vmem:[%s3680_s28 + $0x30] sm:$0xe]  ;;  %v3471_v53 = vld [vmem:[%s3680_s28 + $0x54] sm:$0xff]  }
  0x87   : > { %3273 = vmatmul.mubr.msk.bf16.gmra.mxu1 %vm434_vm3, %v3465_v6  ;;  %v2432_v6 = vrot.slane %v3044_v15, 5  ;;  %v2431_v25 = vrot.slane %v2429_v28, 4  ;;  %v4308_v37 = vrot.slane %v2071_v22, 5  ;;  %v2077_v14 = vrot.slane %v2075_v39, 4 }
  0x88   : > { %3296 = vmatprep.mubr.msk.bf16.mxu1 %vm434_vm3, %v2991_v23  ;;  %v4289_v23 = vld [vmem:[%s3680_s28 + $0x2c] sm:$0x1]  ;;  %v2055_v58 = vrot.slane %v2054_v42, 4  ;;  %v2059_v41 = vrot.slane %v2057_v11, 5  ;;  %v2068_v29 = vor.u32 %v2067_v49, %v2064_v13  ;;  %v2095_v46 = vshll.u32 %v4301_v27, 16  ;;  %v3472_v11 = vld [vmem:[%s3680_s28 + $0x60] sm:$0xff]  }
  0x89   : > { %v2081_v34 = vshll.u32 %v4289_v23, 16  ;;  %v2099_v45 = vshrl.u32 %v4301_v27, 16  ;;  %v2998_v40 = vcombine.low %v4293_v8, %v4297_v16  ;;  %v2050_v50 = vsel %vm3721_vm4, %v2045_v9, %v4253_v62  ;;  %v4345_v62 = vld [vmem:[%s3680_s28 + $0x40] sm:$0xf] }
  0x8a   : > { %v2078_v12 = vor.u32 %v2077_v14, %v4308_v37  ;;  %v2436_v5 = vrot.slane %v4256_v55, 5  ;;  %v2060_v47 = vsel %vm3721_vm4, %v2055_v58, %v2059_v41  ;;  %v2069_v18 = vrot.slane %v2068_v29, 4  ;;  %v3086_v29 = vld [vmem:[%s3680_s28 + $0x3c] sm:$0xe] }
  0x8b   : > { %3315 = vmatmul.mubr.msk.bf16.vlgmr.msra.gmra.mxu0 %vm434_vm3, %v3467_v36  ;;  %v2089_v36 = vshll.u32 %v3048_v26, 16  ;;  %v2083_v43 = vrot.slane %v2081_v34, 5  ;;  %v3092_v56 = vrot.slane %v3084_v17, 9  ;;  %v4348_v15 = vrot.slane %v2095_v46, 5 }
  0x8c   : > { %3349 = vmatpush3.bf16.msra.mxu0 %v2534_v1  ;;  %3318 = vmatprep.mubr.msk.bf16.mxu0 %vm434_vm3, %v3468_v4  ;;  %v4286_v1 = vsel %vm3857_vm7, %v1635_v35, %v1636_v44  ;;  %v4336_v4 = vsel %vm3857_vm7, %v2431_v25, %v2432_v6  ;;  %v2101_v59 = vrot.slane %v2099_v45, 4  ;;  %v2439_v55 = vrot.slane %v4289_v23, 5  ;;  %v3054_v6 = vld [vmem:[%s3680_s28 + $0x48] sm:$0xf] }
  0x8d   : > { %v2997_v0 = vcombine.low %v4282_v10, %v4286_v1  ;;  %v2091_v44 = vrot.slane %v2089_v36, 5  ;;  %v2443_v63 = vrot.slane %v4301_v27, 5  ;;  %v2110_v3 = vshrl.u32 %v3051_v52, 16 }
  0x8e   : > { %v2113_v7 = vshll.u32 %v3051_v52, 16  ;;  %v2438_v22 = vrot.slane %v2436_v5, 4  ;;  %v2119_v39 = vshll.u32 %v4345_v62, 16  ;;  %v2123_v42 = vshrl.u32 %v4345_v62, 16 }
  0x8f   : > { %3297 = vmatmul.mubr.msk.bf16.vlgmr.msra.gmra.mxu1 %vm434_vm3, %v2992_v20  ;;  %v2086_v20 = vshrl.u32 %v3048_v26, 16  ;;  %v4362_v13 = vcombine.low %v2050_v50, %v2060_v47  ;;  %v2074_v24 = vsel %vm3721_vm4, %v2069_v18, %v4308_v37  ;;  %v4371_v19 = vsel %vm3857_vm7, %v3092_v56, %v2436_v5  ;;  %v4376_v26 = vld [vmem:[%s3680_s28 + $0x4c] sm:$0xf] }
  0x90   : > { %3331 = vmatpush3.bf16.msra.mxu1 %v4187_v61  ;;  %3300 = vmatprep.mubr.msk.bf16.mxu1 %vm434_vm3, %v2993_v38  ;;  %v2996_v61 = vcombine.low %v4249_v57, %v4278_v54  ;;  %v4328_v38 = vsel %vm3857_vm7, %v3091_v51, %v2429_v28  ;;  %v2079_v28 = vrot.slane %v2078_v12, 4  ;;  %v2102_v23 = vor.u32 %v2101_v59, %v4348_v15  ;;  %v3473_v47 = vld [vmem:[%s3680_s28 + $0x6c] sm:$0xff]  }
  0x91   : > { %v2088_v35 = vrot.slane %v2086_v20, 4  ;;  %v3100_v49 = vcombine.low %v4328_v38, %v4336_v4  ;;  %v3093_v51 = vrot.slane %v3085_v48, 9  ;;  %v2445_v27 = vrot.slane %v2443_v63, 4 }
  0x92   : > { %v2112_v9 = vrot.slane %v2110_v3, 4  ;;  %v2115_v25 = vrot.slane %v2113_v7, 5  ;;  %v2084_v37 = vsel %vm3721_vm4, %v2079_v28, %v2083_v43  ;;  %v4383_v14 = vsel %vm3857_vm7, %v2438_v22, %v2439_v55  ;;  %v3057_v55 = vld [vmem:[%s3680_s28 + $0x54] sm:$0xf] }
  0x93   : > { %3319 = vmatmul.mubr.msk.bf16.gmra.mxu0 %vm434_vm3, %v3469_v31  ;;  %v2446_v31 = vrot.slane %v3050_v60, 5  ;;  %v4386_v58 = vrot.slane %v2119_v39, 5  ;;  %v2125_v41 = vrot.slane %v2123_v42, 4  ;;  %v2134_v34 = vshrl.u32 %v3054_v6, 16  ;;  %v3060_v42 = vld [vmem:[%s3680_s28 + $0x60] sm:$0xf] }
  0x94   : > { %3322 = vmatprep.mubr.msk.bf16.mxu0 %vm434_vm3, %v3470_v33  ;;  %v3053_v33 = vld [vmem:[%s3680_s28 + $0x44] sm:$0x1]  ;;  %v2137_v17 = vshll.u32 %v3054_v6, 16  ;;  %v2143_v20 = vshll.u32 %v4376_v26, 16  ;;  %v2147_v36 = vshrl.u32 %v4376_v26, 16  ;;  %v4394_v45 = vrot.slane %v2102_v23, 4 }
  0x95   : > { %v4400_v50 = vsel %vm3857_vm7, %v3093_v51, %v2443_v63  ;;  %v4404_v4 = vsel %vm3857_vm7, %v2445_v27, %v2446_v31  ;;  %v2116_v12 = vor.u32 %v2115_v25, %v2112_v9  ;;  %v2129_v5 = vshll.u32 %v3053_v33, 16  ;;  %v4449_v23 = vld [vmem:[%s3680_s28 + $0x64] sm:$0xf] }
  0x96   : > { %v2450_v52 = vrot.slane %v4345_v62, 5  ;;  %v4412_v18 = vcombine.low %v2074_v24, %v2084_v37  ;;  %v3101_v43 = vcombine.low %v4371_v19, %v4383_v14  ;;  %v2126_v56 = vor.u32 %v2125_v41, %v4386_v58 }
  0x97   : > { %3301 = vmatmul.mubr.msk.bf16.gmra.mxu1 %vm434_vm3, %v2994_v32  ;;  %v2092_v32 = vor.u32 %v2091_v44, %v2088_v35  ;;  %v3056_v35 = vld [vmem:[%s3680_s28 + $0x50] sm:$0x1]  ;;  %v2136_v57 = vrot.slane %v2134_v34, 4  ;;  %v2139_v54 = vrot.slane %v2137_v17, 5  ;;  %v2149_v62 = vrot.slane %v2147_v36, 4 }
  0x98   : > { %3304 = vmatprep.mubr.msk.bf16.mxu1 %vm434_vm3, %v2995_v2  ;;  %v2105_v2 = vshll.u32 %v3050_v60, 16  ;;  %v3094_v60 = vrot.slane %v3086_v29, 9  ;;  %v3087_v44 = vld [vmem:[%s3680_s28 + $0x48] sm:$0xe]  ;;  %v3102_v1 = vcombine.low %v4400_v50, %v4404_v4  ;;  %v2117_v48 = vrot.slane %v2116_v12, 4 }
  0x99   : > { %v4392_v46 = vrot.slane %v2092_v32, 4  ;;  %v2131_v63 = vrot.slane %v2129_v5, 5  ;;  %v2452_v3 = vrot.slane %v2450_v52, 4  ;;  %v2453_v7 = vrot.slane %v3053_v33, 5  ;;  %v3059_v29 = vld [vmem:[%s3680_s28 + $0x5c] sm:$0x1] }
  0x9a   : > { %v4396_v38 = vrot.slane %v2105_v2, 5  ;;  %v4443_v28 = vsel %vm3857_vm7, %v3094_v60, %v2450_v52  ;;  %v2153_v22 = vshll.u32 %v3056_v35, 16  ;;  %v3095_v39 = vrot.slane %v3087_v44, 9  ;;  %v3062_v12 = vld [vmem:[%s3680_s28 + $0x68] sm:$0x1] }
  0x9b   : > { %3323 = vmatmul.mubr.msk.bf16.gmra.mxu0 %vm434_vm3, %v3471_v53  ;;  %v2098_v59 = vsel %vm3721_vm4, %v4392_v46, %v4348_v15  ;;  %v4438_v53 = vld [vmem:[%s3680_s28 + $0x58] sm:$0xf]  ;;  %v2127_v15 = vrot.slane %v2126_v56, 4  ;;  %v2460_v19 = vrot.slane %v3056_v35, 5  ;;  %v2158_v32 = vshrl.u32 %v3057_v55, 16 }
  0x9c   : > { %3326 = vmatprep.mubr.msk.bf16.mxu0 %vm434_vm3, %v3472_v11  ;;  %v2108_v10 = vsel %vm3721_vm4, %v4394_v45, %v4396_v38  ;;  %v2140_v11 = vor.u32 %v2139_v54, %v2136_v57  ;;  %v2161_v51 = vshll.u32 %v3057_v55, 16  ;;  %v2167_v6 = vshll.u32 %v4438_v53, 16  ;;  %v3088_v46 = vld [vmem:[%s3680_s28 + $0x54] sm:$0xe]  ;;  %v3063_v57 = vld [vmem:[%s3680_s28 + $0x6c] sm:$0xf] }
  0x9d   : > { %v2122_v27 = vsel %vm3721_vm4, %v2117_v48, %v4386_v58  ;;  %v2182_v31 = vshrl.u32 %v3060_v42, 16  ;;  %v2185_v9 = vshll.u32 %v3060_v42, 16  ;;  %v2132_v25 = vsel %vm3721_vm4, %v2127_v15, %v2131_v63 }
  0x9e   : > { %v2155_v37 = vrot.slane %v2153_v22, 5  ;;  %v2191_v14 = vshll.u32 %v4449_v23, 16  ;;  %v2195_v33 = vshrl.u32 %v4449_v23, 16  ;;  %v2141_v58 = vrot.slane %v2140_v11, 4 }
  0x9f   : > { %3305 = vmatmul.mubr.msk.bf16.gmra.mxu1 %vm434_vm3, %v2996_v61  ;;  %v4422_v61 = vrot.slane %v2143_v20, 5  ;;  %v2160_v16 = vrot.slane %v2158_v32, 4  ;;  %v2163_v34 = vrot.slane %v2161_v51, 5  ;;  %v4475_v17 = vrot.slane %v2167_v6, 5  ;;  %v3065_v6 = vld [vmem:[%s3680_s28 + $0x74] sm:$0x1] }
  0xa0   : > { %3308 = vmatprep.mubr.msk.bf16.mxu1 %vm434_vm3, %v2997_v0  ;;  %v2457_v0 = vrot.slane %v4376_v26, 5  ;;  %v2171_v26 = vshrl.u32 %v4438_v53, 16  ;;  %v3069_v36 = vcombine.low %v2098_v59, %v2108_v10  ;;  %v2184_v45 = vrot.slane %v2182_v31, 4  ;;  %v3064_v10 = vld [vmem:[%s3680_s28 + $0x70] sm:$0xf] }
  0xa1   : > { %v2150_v24 = vor.u32 %v2149_v62, %v4422_v61  ;;  %v2187_v38 = vrot.slane %v2185_v9, 5  ;;  %v3070_v50 = vcombine.low %v2122_v27, %v2132_v25  ;;  %v4483_v5 = vrot.slane %v2191_v14, 5  ;;  %v3090_v25 = vld [vmem:[%s3680_s28 + $0x6c] sm:$0xe] }
  0xa2   : > { %v2459_v2 = vrot.slane %v2457_v0, 4  ;;  %v2458_v8 = vsel %vm3857_vm7, %v3095_v39, %v2457_v0  ;;  %v2173_v20 = vrot.slane %v2171_v26, 4  ;;  %v2197_v52 = vrot.slane %v2195_v33, 4 }
  0xa3   : > { %3327 = vmatmul.mubr.msk.bf16.gmra.mxu0 %vm434_vm3, %v3473_v47  ;;  %v2151_v41 = vrot.slane %v2150_v24, 4  ;;  %v2146_v47 = vsel %vm3721_vm4, %v2141_v58, %v4422_v61  ;;  %v2471_v35 = vrot.slane %v4449_v23, 5  ;;  %v2164_v54 = vor.u32 %v2163_v34, %v2160_v16 }
  0xa4   : > { %3350 = vmatprep.mubr.msk.bf16.mxu0 %vm434_vm3, %v3100_v49  ;;  %v4458_v49 = vsel %vm3857_vm7, %v2452_v3, %v2453_v7  ;;  %v2174_v62 = vor.u32 %v2173_v20, %v4475_v17  ;;  %v2177_v44 = vshll.u32 %v3059_v29, 16  ;;  %v3096_v59 = vrot.slane %v3088_v46, 9 }
  0xa5   : > { %v3103_v4 = vcombine.low %v4443_v28, %v4458_v49  ;;  %v2156_v56 = vsel %vm3721_vm4, %v2151_v41, %v2155_v37  ;;  %v2188_v55 = vor.u32 %v2187_v38, %v2184_v45  ;;  %v2201_v48 = vshll.u32 %v3062_v12, 16 }
  0xa6   : > { %v2198_v61 = vor.u32 %v2197_v52, %v4483_v5  ;;  %v2206_v3 = vshrl.u32 %v3063_v57, 16  ;;  %v2209_v7 = vshll.u32 %v3063_v57, 16  ;;  %v2474_v15 = vrot.slane %v3062_v12, 5 }
  0xa7   : > { %3309 = vmatmul.mubr.msk.bf16.gmra.mxu1 %vm434_vm3, %v2998_v40  ;;  %v2461_v40 = vsel %vm3857_vm7, %v2459_v2, %v2460_v19  ;;  %v2215_v28 = vshll.u32 %v3064_v10, 16  ;;  %v2219_v22 = vshrl.u32 %v3064_v10, 16  ;;  %v3071_v39 = vcombine.low %v2146_v47, %v2156_v56 }
  0xa8   : > { %3332 = vmatprep.mubr.msk.bf16.mxu1 %vm434_vm3, %v4362_v13  ;;  %v2464_v13 = vrot.slane %v4438_v53, 5  ;;  %v3104_v60 = vcombine.low %v2458_v8, %v2461_v40  ;;  %v2473_v53 = vrot.slane %v2471_v35, 4  ;;  %v2165_v42 = vrot.slane %v2164_v54, 4 }
  0xa9   : > { %v2175_v11 = vrot.slane %v2174_v62, 4  ;;  %v2179_v24 = vrot.slane %v2177_v44, 5  ;;  %v2189_v32 = vrot.slane %v2188_v55, 4  ;;  %v2203_v23 = vrot.slane %v2201_v48, 5 }
  0xaa   : > { %v2466_v0 = vrot.slane %v2464_v13, 4  ;;  %v2199_v2 = vrot.slane %v2198_v61, 4  ;;  %v2208_v26 = vrot.slane %v2206_v3, 4  ;;  %v2211_v27 = vrot.slane %v2209_v7, 5 }
  0xab   : > { %3351 = vmatmul.mubr.msk.bf16.vlgmr.msra.gmra.mxu0 %vm434_vm3, %v3101_v43  ;;  %v3089_v43 = vld [vmem:[%s3680_s28 + $0x60] sm:$0xe]  ;;  %v2475_v49 = vsel %vm3857_vm7, %v2473_v53, %v2474_v15  ;;  %v2217_v31 = vrot.slane %v2215_v28, 5  ;;  %v2221_v9 = vrot.slane %v2219_v22, 4  ;;  %v2478_v37 = vrot.slane %v3064_v10, 5 }
  0xac   : > { %3354 = vmatprep.mubr.msk.bf16.mxu0 %vm434_vm3, %v3102_v1  ;;  %v2467_v1 = vrot.slane %v3059_v29, 5  ;;  %v3097_v63 = vrot.slane %v3089_v43, 9  ;;  %v2170_v14 = vsel %vm3721_vm4, %v2165_v42, %v4475_v17  ;;  %v2180_v33 = vsel %vm3721_vm4, %v2175_v11, %v2179_v24 }
  0xad   : > { %v2194_v41 = vsel %vm3721_vm4, %v2189_v32, %v4483_v5  ;;  %v2204_v8 = vsel %vm3721_vm4, %v2199_v2, %v2203_v23  ;;  %v2225_v40 = vshll.u32 %v3065_v6, 16  ;;  %v3098_v29 = vrot.slane %v3090_v25, 9 }
  0xae   : > { %v2468_v19 = vsel %vm3857_vm7, %v2466_v0, %v2467_v1  ;;  %v2472_v51 = vsel %vm3857_vm7, %v3097_v63, %v2471_v35  ;;  %v2212_v34 = vor.u32 %v2211_v27, %v2208_v26  ;;  %v2222_v17 = vor.u32 %v2221_v9, %v2217_v31 }
  0xaf   : > { %3333 = vmatmul.mubr.msk.bf16.vlgmr.msra.gmra.mxu1 %vm434_vm3, %v4412_v18  ;;  %v2465_v18 = vsel %vm3857_vm7, %v3096_v59, %v2464_v13  ;;  %v3106_v16 = vcombine.low %v2472_v51, %v2475_v49  ;;  %v2480_v20 = vrot.slane %v2478_v37, 4  ;;  %v3072_v46 = vcombine.low %v2170_v14, %v2180_v33 }
  0xb0   : > { %3336 = vmatprep.mubr.msk.bf16.mxu1 %vm434_vm3, %v3069_v36  ;;  %v3105_v58 = vcombine.low %v2465_v18, %v2468_v19  ;;  %v2481_v36 = vrot.slane %v3065_v6, 5  ;;  %v3073_v13 = vcombine.low %v2194_v41, %v2204_v8  ;;  %v2227_v45 = vrot.slane %v2225_v40, 5 }
  0xb1   : > { %v2213_v38 = vrot.slane %v2212_v34, 4 }
  0xb2   : > { %v2482_v12 = vsel %vm3857_vm7, %v2480_v20, %v2481_v36 }
  0xb3   : > { %3355 = vmatmul.mubr.msk.bf16.gmra.mxu0 %vm434_vm3, %v3103_v4  ;;  %v2479_v4 = vsel %vm3857_vm7, %v3098_v29, %v2478_v37  ;;  %v2218_v52 = vsel %vm3721_vm4, %v2213_v38, %v2217_v31 }
  0xb4   : > { %3358 = vmatprep.mubr.msk.bf16.mxu0 %vm434_vm3, %v3104_v60  ;;  %v3107_v5 = vcombine.low %v2479_v4, %v2482_v12 }
  0xb7   : > { %3337 = vmatmul.mubr.msk.bf16.gmra.mxu1 %vm434_vm3, %v3070_v50  ;;  %v2223_v50 = vrot.slane %v2222_v17, 4 }
  0xb8   : > { %3340 = vmatprep.mubr.msk.bf16.mxu1 %vm434_vm3, %v3071_v39 }
  0xb9   : > { %v2228_v47 = vsel %vm3721_vm4, %v2223_v50, %v2227_v45 }
  0xba   : > { %v3074_v56 = vcombine.low %v2218_v52, %v2228_v47 }
  0xbb   : > { %3359 = vmatmul.mubr.msk.bf16.gmra.mxu0 %vm434_vm3, %v3105_v58 }
  0xbc   : > { %3362 = vmatprep.mubr.msk.bf16.mxu0 %vm434_vm3, %v3106_v16 }
  0xbf   : > { %3341 = vmatmul.mubr.msk.bf16.gmra.mxu1 %vm434_vm3, %v3072_v46 }
  0xc0   : > { %3344 = vmatprep.mubr.msk.bf16.mxu1 %vm434_vm3, %v3073_v13 }
  0xc3   : > { %3363 = vmatmul.mubr.msk.bf16.gmra.mxu0 %vm434_vm3, %v3107_v5 }
  0xc7   : > { %3345 = vmatmul.mubr.msk.bf16.gmra.mxu1 %vm434_vm3, %v3074_v56 }
  0xf2   : > { %v3208_v60 = vpop.f32.mrf.mxu0 }
  0xf4   : > { %v497_v21 = vpop.f32.mrf.mxu0 }
  0xf6   : > { %v3209_v57 = vpop.f32.mrf.mxu0 }
  0xf7   : > { %v3216_v43 = vpop.f32.mrf.mxu1 }
  0xf8   : > { %v500_v62 = vpop.f32.mrf.mxu0 }
  0xf9   : > { %v529_v35 = vpop.f32.mrf.mxu1 }
  0xfb   : > { %v3217_v54 = vpop.f32.mrf.mxu1 }
  0xfd   : > { %v532_v44 = vpop.f32.mrf.mxu1 }
 0x103   : > { %v3212_v59 = vpop.f32.mrf.mxu0 }
 0x105   : > { %v513_v10 = vpop.f32.mrf.mxu0 }
 0x107   : > { %v3220_v0 = vpop.f32.mrf.mxu1  ;;  %v3213_v1 = vpop.f32.mrf.mxu0 }
 0x109   : > { %v545_v55 = vpop.f32.mrf.mxu1  ;;  %v516_v30 = vpop.f32.mrf.mxu0 }
 0x10b   : > { %v3221_v48 = vpop.f32.mrf.mxu1  ;;  %v3244_v61 = vpop.f32.mrf.mxu0 }
 0x10d   : > { %v4538_v63 = vpop.f32.mrf.mxu1  ;;  %v894_v3 = vpop.f32.mrf.mxu0 }
 0x10f   : > { %v3226_v7 = vpop.f32.mrf.mxu1  ;;  %v3245_v53 = vpop.f32.mrf.mxu0 }
 0x110   : > { %v670_v15 = vadd.f32 %v3226_v7, %v3208_v60 }
 0x111   : > { %v661_v28 = vpop.f32.mrf.mxu1  ;;  %v897_v22 = vpop.f32.mrf.mxu0 }
 0x112   : > { %v959_v39 = vadd.f32 %v3244_v61, %v670_v15  ;;  %v662_v42 = vadd.f32 %v661_v28, %v497_v21 }
 0x113   : > { %v3227_v11 = vpop.f32.mrf.mxu1  ;;  %v3248_v24 = vpop.f32.mrf.mxu0 }
 0x114   : > { %v4540_v18 = vadd.f32 %v894_v3, %v662_v42  ;;  %v673_v19 = vadd.f32 %v3227_v11, %v3209_v57 }
 0x115   : > { %v664_v32 = vpop.f32.mrf.mxu1  ;;  %v910_v23 = vpop.f32.mrf.mxu0 }
 0x116   : > { %v4542_v2 = vadd.f32 %v3245_v53, %v673_v19  ;;  %v665_v51 = vadd.f32 %v664_v32, %v500_v62 }
 0x117   : > { %v3230_v6 = vpop.f32.mrf.mxu1  ;;  %v3249_v26 = vpop.f32.mrf.mxu0 }
 0x118   : > { %v4544_v27 = vadd.f32 %v897_v22, %v665_v51  ;;  %v686_v49 = vadd.f32 %v3230_v6, %v3212_v59 }
 0x119   : > { %v677_v31 = vpop.f32.mrf.mxu1  ;;  %v913_v9 = vpop.f32.mrf.mxu0 }
 0x11a   : > { %v963_v25 = vadd.f32 %v3248_v24, %v686_v49  ;;  %v678_v37 = vadd.f32 %v677_v31, %v513_v10 }
 0x11b   : > { %v3231_v14 = vpop.f32.mrf.mxu1  ;;  %v3252_v33 = vpop.f32.mrf.mxu0 }
 0x11c   : > { %v4546_v58 = vadd.f32 %v910_v23, %v678_v37  ;;  %v689_v41 = vadd.f32 %v3231_v14, %v3213_v1 }
 0x11d   : > { %v680_v8 = vpop.f32.mrf.mxu1  ;;  %v926_v16 = vpop.f32.mrf.mxu0 }
 0x11e   : > { %v4548_v40 = vadd.f32 %v3249_v26, %v689_v41  ;;  %v681_v29 = vadd.f32 %v680_v8, %v516_v30 }
 0x11f   : > { %v3234_v34 = vpop.f32.mrf.mxu1  ;;  %v3253_v17 = vpop.f32.mrf.mxu0 }
 0x120   : > { %v4550_v20 = vadd.f32 %v913_v9, %v681_v29  ;;  %v702_v36 = vadd.f32 %v3234_v34, %v3216_v43 }
 0x121   : > { %v693_v46 = vpop.f32.mrf.mxu1  ;;  %v929_v13 = vpop.f32.mrf.mxu0 }
 0x122   : > { %v967_v45 = vadd.f32 %v3252_v33, %v702_v36  ;;  %v694_v38 = vadd.f32 %v693_v46, %v529_v35 }
 0x123   : > { %v3235_v50 = vpop.f32.mrf.mxu1  ;;  %v3256_v4 = vpop.f32.mrf.mxu0 }
 0x124   : > { %v4552_v12 = vadd.f32 %v926_v16, %v694_v38  ;;  %v705_v5 = vadd.f32 %v3235_v50, %v3217_v54 }
 0x125   : > { %v696_v52 = vpop.f32.mrf.mxu1  ;;  %v942_v47 = vpop.f32.mrf.mxu0 }
 0x126   : > { %v4554_v56 = vadd.f32 %v3253_v17, %v705_v5  ;;  %v697_v60 = vadd.f32 %v696_v52, %v532_v44 }
 0x127   : > { %v3238_v21 = vpop.f32.mrf.mxu1  ;;  %v3257_v57 = vpop.f32.mrf.mxu0 }
 0x128   : > { %v4556_v62 = vadd.f32 %v929_v13, %v697_v60  ;;  %v718_v59 = vadd.f32 %v3238_v21, %v3220_v0 }
 0x129   : > { %v709_v43 = vpop.f32.mrf.mxu1  ;;  %v945_v10 = vpop.f32.mrf.mxu0 }
 0x12a   : > { %v971_v1 = vadd.f32 %v3256_v4, %v718_v59  ;;  %v710_v30 = vadd.f32 %v709_v43, %v545_v55 }
 0x12b   : > { %v3239_v35 = vpop.f32.mrf.mxu1  ;;  %v3280_v61 = vpop.f32.mrf.mxu0 }
 0x12c   : > { %v4558_v3 = vadd.f32 %v942_v47, %v710_v30  ;;  %v721_v7 = vadd.f32 %v3239_v35, %v3221_v48 }
 0x12d   : > { %v712_v54 = vpop.f32.mrf.mxu1  ;;  %v4560_v53 = vpop.f32.mrf.mxu0 }
 0x12e   : > { %v4562_v15 = vadd.f32 %v3257_v57, %v721_v7  ;;  %v713_v44 = vadd.f32 %v712_v54, %v4538_v63 }
 0x12f   : > { %v3262_v28 = vpop.f32.mrf.mxu1  ;;  %v4565_v22 = vpop.f32.mrf.mxu0 }
 0x130   : > { %v4567_v0 = vadd.f32 %v945_v10, %v713_v44  ;;  %v1161_v42 = vadd.f32 %v3262_v28, %v959_v39 }
 0x131   : > { %v1096_v11 = vpop.f32.mrf.mxu1  ;;  %v4569_v55 = vpop.f32.mrf.mxu0 }
 0x132   : > { %4798 = vst [vmem:[#allocation5_spill] sm:$0xff] %v4567_v0  ;;  %v4571_v24 = vadd.f32 %v3280_v61, %v1161_v42 }
 0x133   : > { %v3263_v19 = vpop.f32.mrf.mxu1  ;;  %v3284_v48 = vpop.f32.mrf.mxu0 }
 0x135   : > { %v4573_v32 = vpop.f32.mrf.mxu1  ;;  %v4575_v23 = vpop.f32.mrf.mxu0 }
 0x137   : > { %v3266_v51 = vpop.f32.mrf.mxu1  ;;  %v4577_v6 = vpop.f32.mrf.mxu0 }
 0x138   : > { %v1165_v63 = vadd.f32 %v3266_v51, %v963_v25 }
 0x139   : > { %v4579_v26 = vpop.f32.mrf.mxu1  ;;  %v4581_v49 = vpop.f32.mrf.mxu0 }
 0x13a   : > { %v4583_v39 = vadd.f32 %v3284_v48, %v1165_v63 }
 0x13b   : > { %v4585_v31 = vpop.f32.mrf.mxu1  ;;  %v3288_v9 = vpop.f32.mrf.mxu0 }
 0x13d   : > { %v4587_v37 = vpop.f32.mrf.mxu1  ;;  %v4589_v14 = vpop.f32.mrf.mxu0 }
 0x13f   : > { %v3270_v33 = vpop.f32.mrf.mxu1  ;;  %v4591_v41 = vpop.f32.mrf.mxu0 }
 0x140   : > { %v1169_v8 = vadd.f32 %v3270_v33, %v967_v45 }
 0x141   : > { %v4593_v16 = vpop.f32.mrf.mxu1  ;;  %v4595_v25 = vpop.f32.mrf.mxu0 }
 0x142   : > { %v4597_v29 = vadd.f32 %v3288_v9, %v1169_v8 }
 0x143   : > { %v4599_v34 = vpop.f32.mrf.mxu1  ;;  %v3292_v17 = vpop.f32.mrf.mxu0 }
 0x145   : > { %v4601_v36 = vpop.f32.mrf.mxu1  ;;  %v4603_v46 = vpop.f32.mrf.mxu0 }
 0x147   : > { %v3274_v13 = vpop.f32.mrf.mxu1  ;;  %v4605_v38 = vpop.f32.mrf.mxu0 }
 0x148   : > { %v1173_v50 = vadd.f32 %v3274_v13, %v971_v1 }
 0x149   : > { %v4607_v4 = vpop.f32.mrf.mxu1  ;;  %v4609_v45 = vpop.f32.mrf.mxu0 }
 0x14a   : > { %4799 = vst [vmem:[#allocation6_spill] sm:$0xff] %v4609_v45  ;;  %v4611_v5 = vadd.f32 %v3292_v17, %v1173_v50 }
 0x14b   : > { %v4613_v52 = vpop.f32.mrf.mxu1  ;;  %v3316_v47 = vpop.f32.mrf.mxu0 }
 0x14c   : > { %4800 = vst [vmem:[#allocation7_spill] sm:$0xff] %v4611_v5 }
 0x14d   : > { %v4615_v60 = vpop.f32.mrf.mxu1  ;;  %v1934_v21 = vpop.f32.mrf.mxu0 }
 0x14e   : > { %4801 = vst [vmem:[#allocation8_spill] sm:$0xff] %v4615_v60  ;;  %v1159_v60 = vadd.f32 %v1096_v11, %v4540_v18 }
 0x14f   : > { %v3298_v57 = vpop.f32.mrf.mxu1  ;;  %v3317_v59 = vpop.f32.mrf.mxu0 }
 0x150   : > { %v1797_v11 = vadd.f32 %v3298_v57, %v4571_v24 }
 0x151   : > { %v1732_v43 = vpop.f32.mrf.mxu1  ;;  %v1937_v10 = vpop.f32.mrf.mxu0 }
 0x153   : > { %v3299_v30 = vpop.f32.mrf.mxu1  ;;  %v4617_v35 = vpop.f32.mrf.mxu0 }
 0x155   : > { %v1735_v1 = vpop.f32.mrf.mxu1  ;;  %v4619_v61 = vpop.f32.mrf.mxu0 }
 0x157   : > { %v3302_v7 = vpop.f32.mrf.mxu1  ;;  %v4621_v54 = vpop.f32.mrf.mxu0 }
 0x159   : > { %v1748_v44 = vpop.f32.mrf.mxu1  ;;  %v4623_v28 = vpop.f32.mrf.mxu0 }
 0x15a   : > { %4802 = vst [vmem:[#allocation9_spill] sm:$0xff] %v4623_v28 }
 0x15b   : > { %v4625_v42 = vpop.f32.mrf.mxu1  ;;  %v4627_v48 = vpop.f32.mrf.mxu0 }
 0x15c   : > { %4803 = vst [vmem:[#allocation10_spill] sm:$0xff] %v4627_v48 }
 0x15d   : > { %v4629_v51 = vpop.f32.mrf.mxu1  ;;  %v4631_v63 = vpop.f32.mrf.mxu0 }
 0x15e   : > { %4804 = vst [vmem:[#allocation11_spill] sm:$0xff] %v4631_v63 }
 0x15f   : > { %v4633_v9 = vpop.f32.mrf.mxu1  ;;  %v4635_v33 = vpop.f32.mrf.mxu0 }
 0x160   : > { %4805 = vst [vmem:[#allocation12_spill] sm:$0xff] %v4635_v33  ;;  %v1162_v33 = vadd.f32 %v3263_v19, %v4542_v2  ;;  %v1163_v2 = vadd.f32 %v4579_v26, %v4546_v58  ;;  %v1164_v58 = vadd.f32 %v4587_v37, %v4550_v20  ;;  %v1801_v37 = vadd.f32 %v3302_v7, %v4583_v39 }
 0x161   : > { %v4637_v8 = vpop.f32.mrf.mxu1  ;;  %v4639_v17 = vpop.f32.mrf.mxu0 }
 0x162   : > { %4806 = vst [vmem:[#allocation13_spill] sm:$0xff] %v4639_v17  ;;  %v1541_v17 = vadd.f32 %v4560_v53, %v1159_v60  ;;  %v1544_v18 = vadd.f32 %v4565_v22, %v1162_v33  ;;  %v1166_v22 = vadd.f32 %v4585_v31, %v4548_v40 }
 0x163   : > { %v4641_v13 = vpop.f32.mrf.mxu1  ;;  %v4643_v50 = vpop.f32.mrf.mxu0 }
 0x164   : > { %4807 = vst [vmem:[#allocation14_spill] sm:$0xff] %v4641_v13  ;;  %4808 = vst [vmem:[#allocation15_spill] sm:$0xff] %v4643_v50  ;;  %v1160_v50 = vadd.f32 %v4573_v32, %v4544_v27  ;;  %v1798_v53 = vadd.f32 %v3299_v30, %v1544_v18  ;;  %v1999_v27 = vadd.f32 %v3316_v47, %v1797_v11 }
 0x165   : > { %v4645_v45 = vpop.f32.mrf.mxu1  ;;  %v4647_v5 = vpop.f32.mrf.mxu0  ;;  %v1545_v13 = vadd.f32 %v4575_v23, %v1163_v2  ;;  %v1168_v23 = vadd.f32 %v4601_v36, %v4556_v62  ;;  %v1548_v20 = vadd.f32 %v4577_v6, %v1166_v22  ;;  %v4690_v62 = vld [vmem:[%s4790_s2] ss:$0 sm:$0xff] }
 0x166   : > { %4809 = vst [vmem:[#allocation16_spill] sm:$0xff] %v4645_v45  ;;  %4810 = vst [vmem:[#allocation17_spill] sm:$0xff] %v4647_v5  ;;  %v2000_v26 = vadd.f32 %v3317_v59, %v1798_v53  ;;  %v4816_v53 = vld [vmem:[#allocation9_spill] sm:$0xff] }
 0x167   : > { %v4650_v0 = vpop.f32.mrf.mxu1  ;;  %v4652_v63 = vpop.f32.mrf.mxu0  ;;  %v1799_v31 = vadd.f32 %v1748_v44, %v1545_v13  ;;  %v1802_v39 = vadd.f32 %v4625_v42, %v1548_v20  ;;  %v1550_v7 = vadd.f32 %v4595_v25, %v1168_v23  ;;  %v1174_v44 = vadd.f32 %v4613_v52, %v4562_v15 }
 0x168   : > { %4811 = vst [vmem:[#allocation18_spill] sm:$0xff] %v4650_v0  ;;  %4812 = vst [vmem:[#allocation19_spill] sm:$0xff] %v4652_v63  ;;  %v1795_v0 = vadd.f32 %v1732_v43, %v1541_v17 }
 0x169   : > { %v4655_v48 = vpop.f32.mrf.mxu1  ;;  %v4657_v28 = vpop.f32.mrf.mxu0 }
 0x16a   : > { %4813 = vst [vmem:[#allocation20_spill] sm:$0xff] %v4655_v48  ;;  %4814 = vst [vmem:[#allocation21_spill] sm:$0xff] %v4657_v28  ;;  %v1542_v28 = vadd.f32 %v4569_v55, %v1160_v50  ;;  %v1997_v32 = vadd.f32 %v1934_v21, %v1795_v0  ;;  %v1167_v55 = vadd.f32 %v4593_v16, %v4552_v12 }
 0x16b   : > { %v4662_v45 = vpop.f32.mrf.mxu1  ;;  %v3352_v5 = vpop.f32.mrf.mxu0  ;;  %v1170_v0 = vadd.f32 %v4599_v34, %v4554_v56  ;;  %v1546_v12 = vadd.f32 %v4581_v49, %v1164_v58  ;;  %v1171_v56 = vadd.f32 %v4607_v4, %v4558_v3  ;;  %v2001_v3 = vadd.f32 %v4619_v61, %v1799_v31  ;;  %v4820_v31 = vld [vmem:[#allocation11_spill] sm:$0xff] }
 0x16c   : > { %4815 = vst [vmem:[#allocation22_spill] sm:$0xff] %v4662_v45  ;;  %v1796_v45 = vadd.f32 %v1735_v1, %v1542_v28  ;;  %v1549_v36 = vadd.f32 %v4589_v14, %v1167_v55  ;;  %v2004_v50 = vadd.f32 %v4621_v54, %v1802_v39 }
 0x16d   : > { %v4668_v19 = vpop.f32.mrf.mxu1  ;;  %v2570_v63 = vpop.f32.mrf.mxu0  ;;  %v1552_v6 = vadd.f32 %v4591_v41, %v1170_v0  ;;  %v1800_v14 = vadd.f32 %v4629_v51, %v1546_v12  ;;  %v1805_v41 = vadd.f32 %v4633_v9, %v4597_v29  ;;  %v1553_v13 = vadd.f32 %v4603_v46, %v1171_v56  ;;  %v4819_v55 = vld [vmem:[#allocation16_spill] sm:$0xff] }
 0x16e   : > { %v1998_v40 = vadd.f32 %v1937_v10, %v1796_v45  ;;  %v1803_v15 = vadd.f32 %v4637_v8, %v1549_v36  ;;  %v1556_v46 = vadd.f32 %v4605_v38, %v1174_v44  ;;  %v1804_v0 = vadd.f32 %v4819_v55, %v1550_v7  ;;  %v4823_v7 = vld [vmem:[#allocation12_spill] sm:$0xff] }
 0x16f   : > { %v3334_v60 = vpop.f32.mrf.mxu1  ;;  %v3353_v48 = vpop.f32.mrf.mxu0 }
 0x170   : > { %v2381_v43 = vadd.f32 %v3334_v60, %v1999_v27  ;;  %v2002_v60 = vadd.f32 %v4816_v53, %v1800_v14  ;;  %v4817_v27 = vld [vmem:[#allocation10_spill] sm:$0xff] }
 0x171   : > { %v2316_v24 = vpop.f32.mrf.mxu1  ;;  %v2573_v57 = vpop.f32.mrf.mxu0 }
 0x172   : > { %v2379_v33 = vadd.f32 %v2316_v24, %v1997_v32  ;;  %v2635_v16 = vadd.f32 %v3352_v5, %v2381_v43  ;;  %v2007_v32 = vadd.f32 %v4817_v27, %v1805_v41  ;;  %v4818_v43 = vld [vmem:[#allocation14_spill] sm:$0xff] }
 0x173   : > { %v3335_v47 = vpop.f32.mrf.mxu1  ;;  %v3356_v21 = vpop.f32.mrf.mxu0 }
 0x174   : > { %v2633_v30 = vadd.f32 %v2570_v63, %v2379_v33  ;;  %v2382_v1 = vadd.f32 %v3335_v47, %v2000_v26  ;;  %v2003_v63 = vadd.f32 %v4617_v35, %v1801_v37  ;;  %v2658_v25 = vadd.f32 %v4690_v62, %v2635_v16 }
 0x175   : > { %v2319_v59 = vpop.f32.mrf.mxu1  ;;  %v2586_v28 = vpop.f32.mrf.mxu0  ;;  %v1806_v33 = vadd.f32 %v4818_v43, %v1552_v6 }
 0x176   : > { %v2380_v34 = vadd.f32 %v2319_v59, %v1998_v40  ;;  %v2656_v45 = vadd.f32 %v4690_v62, %v2633_v30  ;;  %v2636_v4 = vadd.f32 %v3353_v48, %v2382_v1  ;;  %v2005_v30 = vadd.f32 %v4820_v31, %v1803_v15  ;;  %v4821_v59 = vld [vmem:[#allocation5_spill] sm:$0xff] }
 0x177   : > { %v3338_v10 = vpop.f32.mrf.mxu1  ;;  %v3357_v49 = vpop.f32.mrf.mxu0 }
 0x178   : > { %v2634_v5 = vadd.f32 %v2573_v57, %v2380_v34  ;;  %v2694_v52 = vmul.f32 %v2656_v45, %v2656_v45  ;;  %v2385_v35 = vadd.f32 %v3338_v10, %v2003_v63  ;;  %v2659_v11 = vadd.f32 %v4690_v62, %v2636_v4  ;;  %v4824_v4 = vld [vmem:[#allocation13_spill] sm:$0xff] }
 0x179   : > { %v2332_v42 = vpop.f32.mrf.mxu1  ;;  %v2589_v17 = vpop.f32.mrf.mxu0  ;;  %v2696_v57 = vmul.f32 %v2658_v25, %v2658_v25 }
 0x17a   : > { %v2657_v61 = vadd.f32 %v4690_v62, %v2634_v5  ;;  %v2383_v48 = vadd.f32 %v2332_v42, %v2001_v3  ;;  %v2639_v23 = vadd.f32 %v3356_v21, %v2385_v35  ;;  %v2697_v1 = vmul.f32 %v2659_v11, %v2659_v11  ;;  %v4825_v42 = vld [vmem:[#allocation7_spill] sm:$0xff] }
 0x17b   : > { %v3339_v18 = vpop.f32.mrf.mxu1  ;;  %v3360_v51 = vpop.f32.mrf.mxu0  ;;  %v2008_v3 = vadd.f32 %v4823_v7, %v1806_v33  ;;  %v2006_v5 = vadd.f32 %v4824_v4, %v1804_v0 }
 0x17c   : > { %v2672_v29 = vadd.f32 %v2657_v61, %v2656_v45  ;;  %v2695_v9 = vmul.f32 %v2657_v61, %v2657_v61  ;;  %v2637_v2 = vadd.f32 %v2586_v28, %v2383_v48  ;;  %v2386_v22 = vadd.f32 %v3339_v18, %v2004_v50  ;;  %v4822_v28 = vld [vmem:[#allocation8_spill] sm:$0xff] }
 0x17d   : > { %v2335_v24 = vpop.f32.mrf.mxu1  ;;  %v2602_v54 = vpop.f32.mrf.mxu0  ;;  %v1172_v12 = vadd.f32 %v4822_v28, %v4821_v59  ;;  %v2662_v44 = vadd.f32 %v4690_v62, %v2639_v23 }
 0x17e   : > { %v2673_v8 = vadd.f32 %v2672_v29, %v2658_v25  ;;  %v2710_v58 = vadd.f32 %v2695_v9, %v2694_v52  ;;  %v2660_v26 = vadd.f32 %v4690_v62, %v2637_v2  ;;  %v2384_v47 = vadd.f32 %v2335_v24, %v2002_v60  ;;  %v4826_v25 = vld [vmem:[#allocation18_spill] sm:$0xff] }
 0x17f   : > { %v3342_v40 = vpop.f32.mrf.mxu1  ;;  %v3361_v38 = vpop.f32.mrf.mxu0  ;;  %v2640_v16 = vadd.f32 %v3357_v49, %v2386_v22  ;;  %v1809_v49 = vadd.f32 %v4826_v25, %v4825_v42  ;;  %v4828_v29 = vld [vmem:[#allocation6_spill] sm:$0xff] }
 0x180   : > { %v2711_v20 = vadd.f32 %v2710_v58, %v2696_v57  ;;  %v2674_v37 = vadd.f32 %v2673_v8, %v2659_v11  ;;  %v2698_v56 = vmul.f32 %v2660_v26, %v2660_v26  ;;  %v2638_v34 = vadd.f32 %v2589_v17, %v2384_v47  ;;  %v4827_v17 = vld [vmem:[#allocation20_spill] sm:$0xff]  ;;  %v4829_v2 = vld [vmem:[#allocation22_spill] sm:$0xff] }
 0x181   : > { %v2348_v36 = vpop.f32.mrf.mxu1  ;;  %v2605_v39 = vpop.f32.mrf.mxu0  ;;  %v2389_v10 = vadd.f32 %v3342_v40, %v2007_v32  ;;  %v1807_v61 = vadd.f32 %v4827_v17, %v1553_v13  ;;  %v2663_v15 = vadd.f32 %v4690_v62, %v2640_v16  ;;  %v1554_v9 = vadd.f32 %v4828_v29, %v1172_v12  ;;  %v4832_v40 = vld [vmem:[#allocation19_spill] sm:$0xff] }
 0x182   : > { %v2675_v6 = vadd.f32 %v2674_v37, %v2660_v26  ;;  %v2712_v45 = vadd.f32 %v2711_v20, %v2697_v1  ;;  %v2387_v21 = vadd.f32 %v2348_v36, %v2005_v30  ;;  %v2661_v63 = vadd.f32 %v4690_v62, %v2638_v34  ;;  %v4831_v26 = vld [vmem:[#allocation17_spill] sm:$0xff] }
 0x183   : > { %v3343_v14 = vpop.f32.mrf.mxu1  ;;  %v3364_v41 = vpop.f32.mrf.mxu0  ;;  %v1810_v53 = vadd.f32 %v4829_v2, %v1556_v46  ;;  %v2643_v60 = vadd.f32 %v3360_v51, %v2389_v10  ;;  %v2700_v32 = vmul.f32 %v2662_v44, %v2662_v44  ;;  %v2009_v43 = vadd.f32 %v4831_v26, %v1807_v61 }
 0x184   : > { %v2713_v48 = vadd.f32 %v2712_v45, %v2698_v56  ;;  %v2641_v50 = vadd.f32 %v2602_v54, %v2387_v21  ;;  %v2676_v52 = vadd.f32 %v2675_v6, %v2661_v63  ;;  %v2699_v35 = vmul.f32 %v2661_v63, %v2661_v63  ;;  %v4830_v54 = vld [vmem:[#allocation15_spill] sm:$0xff] }
 0x185   : > { %v2390_v18 = vadd.f32 %v3343_v14, %v2008_v3  ;;  %v2351_v11 = vpop.f32.mrf.mxu1  ;;  %v2618_v8 = vpop.f32.mrf.mxu0  ;;  %v2011_v58 = vadd.f32 %v4830_v54, %v1809_v49  ;;  %v1808_v33 = vadd.f32 %v4668_v19, %v1554_v9  ;;  %v2701_v0 = vmul.f32 %v2663_v15, %v2663_v15  ;;  %v4833_v19 = vld [vmem:[#allocation21_spill] sm:$0xff] }
 0x186   : > { %v2388_v27 = vadd.f32 %v2351_v11, %v2006_v5  ;;  %v2677_v22 = vadd.f32 %v2676_v52, %v2662_v44  ;;  %v2714_v24 = vadd.f32 %v2713_v48, %v2699_v35  ;;  %v2664_v57 = vadd.f32 %v4690_v62, %v2641_v50 }
 0x187   : > { %v3346_v13 = vpop.f32.mrf.mxu1  ;;  %v2644_v46 = vadd.f32 %v3361_v38, %v2390_v18  ;;  %v2012_v31 = vadd.f32 %v4832_v40, %v1810_v53  ;;  %v2666_v30 = vadd.f32 %v4690_v62, %v2643_v60  ;;  %v3365_v16 = vpop.f32.mrf.mxu0  ;;  %v2010_v34 = vadd.f32 %v4833_v19, %v1808_v33 }
 0x188   : > { %v2642_v55 = vadd.f32 %v2605_v39, %v2388_v27  ;;  %v2715_v23 = vadd.f32 %v2714_v24, %v2700_v32  ;;  %v2678_v47 = vadd.f32 %v2677_v22, %v2663_v15  ;;  %v2702_v59 = vmul.f32 %v2664_v57, %v2664_v57 }
 0x189   : > { %v2364_v51 = vpop.f32.mrf.mxu1  ;;  %v2393_v12 = vadd.f32 %v3346_v13, %v2011_v58  ;;  %v2667_v38 = vadd.f32 %v4690_v62, %v2644_v46  ;;  %v2704_v7 = vmul.f32 %v2666_v30, %v2666_v30  ;;  %v2621_v14 = vpop.f32.mrf.mxu0 }
 0x18a   : > { %v2665_v1 = vadd.f32 %v4690_v62, %v2642_v55  ;;  %v2391_v20 = vadd.f32 %v2364_v51, %v2009_v43  ;;  %v2679_v37 = vadd.f32 %v2678_v47, %v2664_v57  ;;  %v2716_v28 = vadd.f32 %v2715_v23, %v2701_v0 }
 0x18b   : > { %v3347_v56 = vpop.f32.mrf.mxu1  ;;  %v2647_v44 = vadd.f32 %v3364_v41, %v2393_v12  ;;  %v2705_v25 = vmul.f32 %v2667_v38, %v2667_v38 }
 0x18c   : > { %v2703_v36 = vmul.f32 %v2665_v1, %v2665_v1  ;;  %v2645_v39 = vadd.f32 %v2618_v8, %v2391_v20  ;;  %v2717_v6 = vadd.f32 %v2716_v28, %v2702_v59  ;;  %v2680_v45 = vadd.f32 %v2679_v37, %v2665_v1 }
 0x18d   : > { %v2394_v10 = vadd.f32 %v3347_v56, %v2012_v31  ;;  %v2367_v21 = vpop.f32.mrf.mxu1  ;;  %v2670_v50 = vadd.f32 %v4690_v62, %v2647_v44 }
 0x18e   : > { %v2392_v3 = vadd.f32 %v2367_v21, %v2010_v34  ;;  %v2681_v4 = vadd.f32 %v2680_v45, %v2666_v30  ;;  %v2718_v5 = vadd.f32 %v2717_v6, %v2703_v36  ;;  %v2668_v63 = vadd.f32 %v4690_v62, %v2645_v39 }
 0x18f   : > { %v2648_v61 = vadd.f32 %v3365_v16, %v2394_v10  ;;  %v2708_v9 = vmul.f32 %v2670_v50, %v2670_v50 }
 0x190   : > { %v2646_v42 = vadd.f32 %v2621_v14, %v2392_v3  ;;  %v2719_v49 = vadd.f32 %v2718_v5, %v2704_v7  ;;  %v2682_v17 = vadd.f32 %v2681_v4, %v2667_v38  ;;  %v2706_v52 = vmul.f32 %v2668_v63, %v2668_v63 }
 0x191   : > { %v2671_v41 = vadd.f32 %v4690_v62, %v2648_v61 }
 0x192   : > { %v2669_v48 = vadd.f32 %v4690_v62, %v2646_v42  ;;  %v2683_v15 = vadd.f32 %v2682_v17, %v2668_v63  ;;  %v2720_v35 = vadd.f32 %v2719_v49, %v2705_v25 }
 0x193   : > { %v2709_v60 = vmul.f32 %v2671_v41, %v2671_v41 }
 0x194   : > { %v2707_v18 = vmul.f32 %v2669_v48, %v2669_v48  ;;  %v2721_v11 = vadd.f32 %v2720_v35, %v2706_v52  ;;  %v2684_v29 = vadd.f32 %v2683_v15, %v2669_v48 }
 0x196   : > { %v2685_v2 = vadd.f32 %v2684_v29, %v2670_v50  ;;  %v2722_v53 = vadd.f32 %v2721_v11, %v2707_v18 }
 0x198   : > { %v2686_v27 = vadd.f32 %v2685_v2, %v2671_v41  ;;  %v2723_v32 = vadd.f32 %v2722_v53, %v2708_v9 }
 0x19a   : > { %v2687_v22 = vrot.slane %v2686_v27, 4  ;;  %v2724_v24 = vadd.f32 %v2723_v32, %v2709_v60 }
 0x19c   : > { %v2688_v57 = vadd.f32 %v2687_v22, %v2686_v27  ;;  %v2725_v13 = vrot.slane %v2724_v24, 4 }
 0x19e   : > { %v2689_v8 = vrot.slane %v2688_v57, 2  ;;  %v2726_v54 = vadd.f32 %v2725_v13, %v2724_v24 }
 0x1a0   : > { %v2690_v58 = vadd.f32 %v2689_v8, %v2688_v57  ;;  %v2727_v26 = vrot.slane %v2726_v54, 2 }
 0x1a2   : > { %v2691_v62 = vrot.slane %v2690_v58, 1  ;;  %v2728_v43 = vadd.f32 %v2727_v26, %v2726_v54 }
 0x1a4   : > { %v2692_v33 = vadd.f32 %v2691_v62, %v2690_v58  ;;  %v2729_v55 = vrot.slane %v2728_v43, 1 }
 0x1a6   : > { %2693 = vst [vmem:[%s177_s8] sm:$0x1] %v2692_v33  ;;  %v2730_v0 = vadd.f32 %v2729_v55, %v2728_v43 }
 0x1a8   : > { %2731 = vst [vmem:[%s177_s8 + $0x1] sm:$0x1] %v2730_v0 }
 0x1a9   : > { %3487 = shalt.err (!%p3484_p6)
}
 0x1aa   : > { %s3488_s28 = scalar_lea.hbm %s2746_s20, 32  ;;  %s3492_s5 = scalar_lea.hbm %s4791_s3, 128 }
 0x1ab   : > { %p3489_p7 = scmp.ne.s32.totalorder %s2746_s20, %s3488_s28  ;;  %p3493_p11 = scmp.lt.s32.totalorder %s2746_s20, %s4791_s3 }
 0x1ac   : > { %p3494_p12 = scmp.lt.s32.totalorder %s3492_s5, %s3488_s28 }
 0x1ad   : > { %p3490_p9 = pnand %p3489_p7, %p3640_p3 }
 0x1ae   : > { %p3495_p13 = por %p3494_p12, %p3493_p11 }
 0x1af   : > { %p3491_p10 = pneg %p3490_p9 }
 0x1b1   : > { %p3496_p0 = pnand %p3495_p13, %p3491_p10 }
 0x1b3   : > { %3499 = shalt.err (!%p3496_p0)
}
 0x1b4   : > { %3379 = dma.vmem_to_hbm [thread:$0]  (%p3640_p3), %s2749_s9, 32, %s2746_s20, %s2733_s16  }
 0x1b5 PF: > { %p3385_p1 = scmp.ge.s32.totalorder %s3566_s19, 2  ;;  %s2760_s8 = sand.u32 1, %s3538_s12  }
 0x1b6   : > { %s2761_s10 = scalar_lea.sflag [#allocation3], %s2760_s8 }
 0x1b7   : > { %p3382_p2 = pnand %p3385_p1, %p3649_p8 }
 0x1b9   : > { %p3383_p4 = pneg %p3382_p2 }
 0x1bb   : > { %3533 = dma.done.wait (%p3383_p4), %s2761_s10, 32  }
 0x1bc   : > { %3535 = vsyncadd (%p3383_p4), %s2761_s10, 4294967264  ;;  %s16_s19 = sadd.s32 1, %s3566_s19   ;;  %s4834_s12 = smov %s3542_s13 }
 0x1bd   : > { %p13_p5 = scmp.ge.s32.totalorder %s16_s19, 6   ;;  %s4835_s13 = smov %s3546_s14 }
 0x1be   : > { %s4836_s14 = smov %s3658_s30  ;;  %s4837_s15 = smov %s3558_s17 }
 0x1bf   : > { %s4838_s16 = smov %s3562_s18  ;;  %s4839_s17 = smov %s4842_s22 }
 0x1c0   : > { %s4840_s18 = smov %s4846_s23  ;;  %15 = sbr.rel (!%p13_p5) target bundleno = 5 (0x5), region = 78 }
 0x1c5   :  { %2766 = vsyncpa [#allocation3], 1 }
 0x1c6   :  { %2768 = vsyncpa [#allocation3 + $0x1], 1 }

</bundles_post_ra>
